<compile_context>
chip_gen: v7x
topology: tpu7x:2x2x1
jax: 0.10.0
libtpu: 0.0.40
codegen_flags: <defaults>
</compile_context>

<pallas_src>
import numpy as np
import jax
import jax.numpy as jnp
from jax.experimental import pallas as pl
from jax.experimental.pallas import tpu as pltpu

# ---------------- small, module-consistent config ----------------
BATCH = 2
SIZE = 64           # signal length s
WIDTH = 16          # lifting width
LEVEL = 2           # wavelet decomposition levels
LAYERS = 2          # wavelet integral blocks
IN_CHANNEL = 2      # (a(x), x) -- grid is concatenated inside forward
GRID_RANGE = 1.0
FC1_HIDDEN = 128
MODES = SIZE // (2 ** LEVEL)   # length of coarsest wavelet coefficients

# db6 orthonormal scaling filter (pywt rec_lo); g = QMF high-pass.
_H_LIST = [0.11154074335008017, 0.4946238903983854, 0.7511339080215775,
           0.3152503517092432, -0.22626469396516913, -0.12976686756709563,
           0.09750160558707936, 0.02752286553001629, -0.031582039318031156,
           0.0005538422009938016, 0.004777257511010651, -0.00107730108499558]
_G_LIST = [((-1.0) ** n) * _H_LIST[len(_H_LIST) - 1 - n] for n in range(len(_H_LIST))]


# ---------------- precomputed periodized db6 transform matrices (host-side) ----------------
def _analysis_pair(s):
    """(A, D) of shape (s, s//2) with a_row = x_row @ A, d_row = x_row @ D."""
    a = np.zeros((s, s // 2), np.float64)
    d = np.zeros((s, s // 2), np.float64)
    for k in range(s // 2):
        for n in range(len(_H_LIST)):
            a[(2 * k + n) % s, k] += _H_LIST[n]
            d[(2 * k + n) % s, k] += _G_LIST[n]
    return a, d


def _composed_analysis(size, level):
    """Composed matrices mapping a length-`size` row to coarsest approx / detail coeffs."""
    ana_a = np.eye(size)
    ana_d = None
    for lvl in range(level):
        a, d = _analysis_pair(size // (2 ** lvl))
        if lvl == level - 1:
            ana_d = ana_a @ d
        ana_a = ana_a @ a
    return ana_a.astype(np.float32), ana_d.astype(np.float32)


def _block_transforms(batch, size, level):
    """Block-diagonal (over batch) analysis / synthesis matrices.

    analysis: (B*S, B*2M)  -- columns = [approx | detail] coeffs per batch block.
    synthesis: (B*2M, B*S) -- orthonormal wavelet => synthesis = analysis^T per block
               (finer detail levels are zeroed, exactly as in the reference WaveConv1d).
    """
    ana_a, ana_d = _composed_analysis(size, level)
    m = ana_a.shape[1]
    both = np.concatenate([ana_a, ana_d], axis=1)                    # (S, 2M)
    ana_blk = np.zeros((batch * size, batch * 2 * m), np.float32)
    syn_blk = np.zeros((batch * 2 * m, batch * size), np.float32)
    for b in range(batch):
        ana_blk[b * size:(b + 1) * size, b * 2 * m:(b + 1) * 2 * m] = both
        syn_blk[b * 2 * m:(b + 1) * 2 * m, b * size:(b + 1) * size] = both.T
    return jnp.asarray(ana_blk), jnp.asarray(syn_blk)


# ---------------- fused Pallas kernel ----------------
def _mish(y):
    # numerically stable softplus: max(y, 0) + log1p(exp(-|y|))
    sp = jnp.maximum(y, 0.0) + jnp.log1p(jnp.exp(-jnp.abs(y)))
    return y * jnp.tanh(sp)


def _make_fused_kernel(n_layers):
    def kernel(*refs):
        x_ref, w0c_ref, tab0_ref, ana_ref, syn_ref = refs[:5]
        layer_refs = refs[5:5 + 3 * n_layers]
        w1t_ref, b1_ref, w2t_ref, b2_ref, out_ref = refs[5 + 3 * n_layers:]

        ana = ana_ref[...]                                            # (B*S, B*2M)
        syn = syn_ref[...]                                            # (B*2M, B*S)

        # fc0 lift with the constant grid channel folded into a bias table (rank-1 update).
        v = w0c_ref[...] * x_ref[...] + tab0_ref[...]                 # (C, B*S)

        for l in range(n_layers):
            wmix_ref, wlt_ref, bl_ref = layer_refs[3 * l:3 * l + 3]
            # wavelet integral: DWT (MXU) -> per-mode channel mix (VPU) -> IDWT (MXU)
            coeff = jnp.dot(v, ana, preferred_element_type=jnp.float32)        # (C, B*2M)
            mixed = jnp.sum(coeff[:, None, :] * wmix_ref[...], axis=0)         # (C, B*2M)
            wave = jnp.dot(mixed, syn, preferred_element_type=jnp.float32)     # (C, B*S)
            # 1x1 conv (channel mixing) + bias, fused with the residual-style add.
            local = jnp.dot(wlt_ref[...], v, preferred_element_type=jnp.float32)
            v = wave + local + bl_ref[...]
            if l != n_layers - 1:
                v = _mish(v)

        # projection head: fc1 (+mish) and fc2, all lane-dense (last dim = B*S = 128).
        h = _mish(jnp.dot(w1t_ref[...], v, preferred_element_type=jnp.float32) + b1_ref[...])
        out = jnp.dot(w2t_ref[...], h, preferred_element_type=jnp.float32) + b2_ref[...]
        out_ref[...] = out.astype(out_ref.dtype)

    return kernel


# ---------------- parameter preparation (done once, outside the hot path) ----------------
def prepare_params(params, batch=BATCH, size=SIZE):
    grid = jnp.linspace(0.0, GRID_RANGE, size, dtype=jnp.float32)
    ana_blk, syn_blk = _block_transforms(batch, size, LEVEL)
    fc0_tab = jnp.outer(params["fc0_w"][1], grid) + params["fc0_b"][:, None]   # (C, S)
    prepared = {
        "w0_col": params["fc0_w"][0].reshape(WIDTH, 1),
        "fc0_tab": jnp.tile(fc0_tab, (1, batch)),                              # (C, B*S)
        "ana_blk": ana_blk,
        "syn_blk": syn_blk,
        "fc1_wt": params["fc1_w"].T,                                           # (128, C)
        "fc1_b": params["fc1_b"].reshape(FC1_HIDDEN, 1),
        "fc2_wt": params["fc2_w"].T,                                           # (1, 128)
        "fc2_b": params["fc2_b"].reshape(1, 1),
    }
    for l in range(LAYERS):
        wmix = jnp.concatenate([params[f"conv{l}_w1"], params[f"conv{l}_w2"]], axis=2)
        prepared[f"wmix{l}"] = jnp.tile(wmix, (1, 1, batch))                   # (Ci, Co, B*2M)
        prepared[f"wl{l}_t"] = params[f"w{l}_w"].T                             # (Co, Ci)
        prepared[f"wl{l}_b"] = params[f"w{l}_b"].reshape(WIDTH, 1)
    return prepared


# ---------------- forward: ONE pallas_call ----------------
def wno1d_forward(prepared, x):
    B, S, _ = x.shape
    x_row = x.reshape(1, B * S)                      # column index = b*S + s

    inputs = [x_row, prepared["w0_col"], prepared["fc0_tab"],
              prepared["ana_blk"], prepared["syn_blk"]]
    for l in range(LAYERS):
        inputs += [prepared[f"wmix{l}"], prepared[f"wl{l}_t"], prepared[f"wl{l}_b"]]
    inputs += [prepared["fc1_wt"], prepared["fc1_b"], prepared["fc2_wt"], prepared["fc2_b"]]

    in_specs = [pl.BlockSpec(a.shape, lambda i, _nd=a.ndim: (0,) * _nd) for a in inputs]
    out = pl.pallas_call(
        _make_fused_kernel(LAYERS),
        out_shape=jax.ShapeDtypeStruct((1, B * S), jnp.float32),
        grid=(1,),   # single fused step; would become ("parallel", ...) if tiled for v7x's 2 TCs
        in_specs=in_specs,
        out_specs=pl.BlockSpec((1, B * S), lambda i: (0, 0)),
        compiler_params=pltpu.CompilerParams(dimension_semantics=("arbitrary",)),
    )(*inputs)
    return out.reshape(B, S, 1)


# ---------------- pure-JAX reference (original roll-based structure, for checking) ----------------
def _dwt_level(x):
    acc_a = jnp.zeros_like(x[:, ::2, :])
    acc_d = jnp.zeros_like(x[:, ::2, :])
    for n in range(len(_H_LIST)):
        xs = jnp.roll(x, -n, axis=1)[:, ::2, :]
        acc_a = acc_a + _H_LIST[n] * xs
        acc_d = acc_d + _G_LIST[n] * xs
    return acc_a, acc_d


def _idwt_level(a, d):
    b, k, c = a.shape
    up_a = jnp.zeros((b, 2 * k, c), a.dtype).at[:, ::2, :].set(a)
    up_d = jnp.zeros((b, 2 * k, c), d.dtype).at[:, ::2, :].set(d)
    x = jnp.zeros((b, 2 * k, c), a.dtype)
    for n in range(len(_H_LIST)):
        x = x + _H_LIST[n] * jnp.roll(up_a, n, axis=1) + _G_LIST[n] * jnp.roll(up_d, n, axis=1)
    return x


def _reference_forward(params, x):
    bsz, s, _ = x.shape
    grid = jnp.broadcast_to(
        jnp.linspace(0.0, GRID_RANGE, s, dtype=jnp.float32).reshape(1, s, 1), (bsz, s, 1))
    v = jnp.concatenate([x, grid], axis=-1) @ params["fc0_w"] + params["fc0_b"]

    def mish(y):
        return y * jnp.tanh(jax.nn.softplus(y))

    for l in range(LAYERS):
        a = v
        details = []
        for _ in range(LEVEL):
            a, d = _dwt_level(a)
            details.append(d)
        out_a = jnp.einsum("bxi,iox->bxo", a, params[f"conv{l}_w1"])
        out_d = jnp.einsum("bxi,iox->bxo", details[-1], params[f"conv{l}_w2"])
        wave = _idwt_level(out_a, out_d)
        for d in reversed(details[:-1]):
            wave = _idwt_level(wave, jnp.zeros_like(d))
        v = wave + v @ params[f"w{l}_w"] + params[f"w{l}_b"]
        if l != LAYERS - 1:
            v = mish(v)
    h = mish(v @ params["fc1_w"] + params["fc1_b"])
    return h @ params["fc2_w"] + params["fc2_b"]


# ---------------- deterministic parameter init (unchanged) ----------------
def init_params(key):
    keys = iter(jax.random.split(key, 8 + 4 * LAYERS))
    params = {}

    def uniform(shape, lo, hi):
        return jax.random.uniform(next(keys), shape, jnp.float32, lo, hi)

    b0 = 1.0 / (IN_CHANNEL ** 0.5)
    params["fc0_w"] = uniform((IN_CHANNEL, WIDTH), -b0, b0)      # (in, out)
    params["fc0_b"] = uniform((WIDTH,), -b0, b0)

    scale = 1.0 / (WIDTH * WIDTH)
    bw = 1.0 / (WIDTH ** 0.5)
    for l in range(LAYERS):
        params[f"conv{l}_w1"] = scale * uniform((WIDTH, WIDTH, MODES), 0.0, 1.0)
        params[f"conv{l}_w2"] = scale * uniform((WIDTH, WIDTH, MODES), 0.0, 1.0)
        params[f"w{l}_w"] = uniform((WIDTH, WIDTH), -bw, bw)     # (in, out) for 1x1 conv
        params[f"w{l}_b"] = uniform((WIDTH,), -bw, bw)

    b1 = 1.0 / (WIDTH ** 0.5)
    params["fc1_w"] = uniform((WIDTH, FC1_HIDDEN), -b1, b1)
    params["fc1_b"] = uniform((FC1_HIDDEN,), -b1, b1)
    b2 = 1.0 / (FC1_HIDDEN ** 0.5)
    params["fc2_w"] = uniform((FC1_HIDDEN, 1), -b2, b2)
    params["fc2_b"] = uniform((1,), -b2, b2)
    return params


if __name__ == "__main__":
    key = jax.random.PRNGKey(0)
    pkey, xkey = jax.random.split(key)
    params = init_params(pkey)
    prepared = prepare_params(params)
    x = jax.random.normal(xkey, (BATCH, SIZE, 1), jnp.float32)   # a(x)

    fwd = jax.jit(wno1d_forward)
    out = jax.block_until_ready(fwd(prepared, x))

    assert out.shape == (BATCH, SIZE, 1)
    assert bool(jnp.all(jnp.isfinite(out)))

    # correctness check against the original per-op (roll-based) formulation
    ref = _reference_forward(params, x)
    max_err = float(jnp.max(jnp.abs(out - ref)))
    assert max_err < 1e-3, f"kernel/reference mismatch: max abs err = {max_err}"

    print("KERNEL_OK")
</pallas_src>

<mosaic_0001>
module attributes {stable_mosaic.version = 11 : i64} {
  func.func @kernel(%arg0: i32, %arg1: memref<1x128xf32, #tpu.memory_space<vmem>>, %arg2: memref<16x1xf32, #tpu.memory_space<vmem>>, %arg3: memref<16x128xf32, #tpu.memory_space<vmem>>, %arg4: memref<128x64xf32, #tpu.memory_space<vmem>>, %arg5: memref<64x128xf32, #tpu.memory_space<vmem>>, %arg6: memref<16x16x64xf32, #tpu.memory_space<vmem>>, %arg7: memref<16x16xf32, #tpu.memory_space<vmem>>, %arg8: memref<16x1xf32, #tpu.memory_space<vmem>>, %arg9: memref<16x16x64xf32, #tpu.memory_space<vmem>>, %arg10: memref<16x16xf32, #tpu.memory_space<vmem>>, %arg11: memref<16x1xf32, #tpu.memory_space<vmem>>, %arg12: memref<128x16xf32, #tpu.memory_space<vmem>>, %arg13: memref<128x1xf32, #tpu.memory_space<vmem>>, %arg14: memref<1x128xf32, #tpu.memory_space<vmem>>, %arg15: memref<1x1xf32, #tpu.memory_space<vmem>>, %arg16: memref<1x128xf32, #tpu.memory_space<vmem>>) attributes {dimension_semantics = [#tpu.dimension_semantics<arbitrary>], iteration_bounds = array<i64: 1>, scalar_prefetch = 0 : i64, scratch_operands = 0 : i64, tpu.core_type = #tpu.core_type<tc>, window_params = [{pipeline_mode = #tpu.pipeline_mode<synchronous>, transform_indices = @transform_0, window_bounds = array<i64: 1, 128>}, {pipeline_mode = #tpu.pipeline_mode<synchronous>, transform_indices = @transform_1, window_bounds = array<i64: 16, 1>}, {pipeline_mode = #tpu.pipeline_mode<synchronous>, transform_indices = @transform_2, window_bounds = array<i64: 16, 128>}, {pipeline_mode = #tpu.pipeline_mode<synchronous>, transform_indices = @transform_3, window_bounds = array<i64: 128, 64>}, {pipeline_mode = #tpu.pipeline_mode<synchronous>, transform_indices = @transform_4, window_bounds = array<i64: 64, 128>}, {pipeline_mode = #tpu.pipeline_mode<synchronous>, transform_indices = @transform_5, window_bounds = array<i64: 16, 16, 64>}, {pipeline_mode = #tpu.pipeline_mode<synchronous>, transform_indices = @transform_6, window_bounds = array<i64: 16, 16>}, {pipeline_mode = #tpu.pipeline_mode<synchronous>, transform_indices = @transform_7, window_bounds = array<i64: 16, 1>}, {pipeline_mode = #tpu.pipeline_mode<synchronous>, transform_indices = @transform_8, window_bounds = array<i64: 16, 16, 64>}, {pipeline_mode = #tpu.pipeline_mode<synchronous>, transform_indices = @transform_9, window_bounds = array<i64: 16, 16>}, {pipeline_mode = #tpu.pipeline_mode<synchronous>, transform_indices = @transform_10, window_bounds = array<i64: 16, 1>}, {pipeline_mode = #tpu.pipeline_mode<synchronous>, transform_indices = @transform_11, window_bounds = array<i64: 128, 16>}, {pipeline_mode = #tpu.pipeline_mode<synchronous>, transform_indices = @transform_12, window_bounds = array<i64: 128, 1>}, {pipeline_mode = #tpu.pipeline_mode<synchronous>, transform_indices = @transform_13, window_bounds = array<i64: 1, 128>}, {pipeline_mode = #tpu.pipeline_mode<synchronous>, transform_indices = @transform_14, window_bounds = array<i64: 1, 1>}, {pipeline_mode = #tpu.pipeline_mode<synchronous>, transform_indices = @transform_15, window_bounds = array<i64: 1, 128>}]} {
    %c0 = arith.constant 0 : index
    %c0_0 = arith.constant 0 : index
    %0 = vector.load %arg4[%c0, %c0_0] : memref<128x64xf32, #tpu.memory_space<vmem>>, vector<128x64xf32>
    %c0_1 = arith.constant 0 : index
    %c0_2 = arith.constant 0 : index
    %1 = vector.load %arg5[%c0_1, %c0_2] : memref<64x128xf32, #tpu.memory_space<vmem>>, vector<64x128xf32>
    %c0_3 = arith.constant 0 : index
    %c0_4 = arith.constant 0 : index
    %2 = vector.load %arg2[%c0_3, %c0_4] : memref<16x1xf32, #tpu.memory_space<vmem>>, vector<16x1xf32>
    %c0_5 = arith.constant 0 : index
    %c0_6 = arith.constant 0 : index
    %3 = vector.load %arg1[%c0_5, %c0_6] : memref<1x128xf32, #tpu.memory_space<vmem>>, vector<1x128xf32>
    %4 = vector.broadcast %2 : vector<16x1xf32> to vector<16x128xf32>
    %5 = vector.broadcast %3 : vector<1x128xf32> to vector<16x128xf32>
    %6 = arith.mulf %4, %5 : vector<16x128xf32>
    %c0_7 = arith.constant 0 : index
    %c0_8 = arith.constant 0 : index
    %7 = vector.load %arg3[%c0_7, %c0_8] : memref<16x128xf32, #tpu.memory_space<vmem>>, vector<16x128xf32>
    %8 = arith.addf %6, %7 : vector<16x128xf32>
    %cst = arith.constant dense<0.000000e+00> : vector<16x64xf32>
    %9 = tpu.matmul %8, %0, %cst {dimension_numbers = #tpu.dot_dimension_numbers<[1], [0], [0], [1], [0, 0, 1, 1], [], []>} : vector<16x128xf32>, vector<128x64xf32>, vector<16x64xf32> -> vector<16x64xf32>
    %10 = vector.shape_cast %9 : vector<16x64xf32> to vector<16x1x64xf32>
    %c0_9 = arith.constant 0 : index
    %c0_10 = arith.constant 0 : index
    %c0_11 = arith.constant 0 : index
    %11 = vector.load %arg6[%c0_9, %c0_10, %c0_11] : memref<16x16x64xf32, #tpu.memory_space<vmem>>, vector<16x16x64xf32>
    %12 = vector.broadcast %10 : vector<16x1x64xf32> to vector<16x16x64xf32>
    %13 = arith.mulf %12, %11 : vector<16x16x64xf32>
    %cst_12 = arith.constant dense<0.000000e+00> : vector<16x64xf32>
    %14 = vector.multi_reduction <add>, %13, %cst_12 [0] : vector<16x16x64xf32> to vector<16x64xf32>
    %cst_13 = arith.constant dense<0.000000e+00> : vector<16x128xf32>
    %15 = tpu.matmul %14, %1, %cst_13 {dimension_numbers = #tpu.dot_dimension_numbers<[1], [0], [0], [1], [0, 0, 1, 1], [], []>} : vector<16x64xf32>, vector<64x128xf32>, vector<16x128xf32> -> vector<16x128xf32>
    %c0_14 = arith.constant 0 : index
    %c0_15 = arith.constant 0 : index
    %16 = vector.load %arg7[%c0_14, %c0_15] : memref<16x16xf32, #tpu.memory_space<vmem>>, vector<16x16xf32>
    %cst_16 = arith.constant dense<0.000000e+00> : vector<16x128xf32>
    %17 = tpu.matmul %16, %8, %cst_16 {dimension_numbers = #tpu.dot_dimension_numbers<[1], [0], [0], [1], [0, 0, 1, 1], [], []>} : vector<16x16xf32>, vector<16x128xf32>, vector<16x128xf32> -> vector<16x128xf32>
    %18 = arith.addf %15, %17 : vector<16x128xf32>
    %c0_17 = arith.constant 0 : index
    %c0_18 = arith.constant 0 : index
    %19 = vector.load %arg8[%c0_17, %c0_18] : memref<16x1xf32, #tpu.memory_space<vmem>>, vector<16x1xf32>
    %20 = vector.broadcast %19 : vector<16x1xf32> to vector<16x128xf32>
    %21 = arith.addf %18, %20 : vector<16x128xf32>
    %cst_19 = arith.constant 0.000000e+00 : f32
    %22 = vector.broadcast %cst_19 : f32 to vector<16x128xf32>
    %23 = arith.maximumf %21, %22 : vector<16x128xf32>
    %24 = math.absf %21 : vector<16x128xf32>
    %cst_20 = arith.constant 0.000000e+00 : f32
    %25 = vector.broadcast %cst_20 : f32 to vector<16x128xf32>
    %26 = arith.subf %25, %24 : vector<16x128xf32>
    %27 = math.exp %26 : vector<16x128xf32>
    %28 = math.log1p %27 : vector<16x128xf32>
    %29 = arith.addf %23, %28 : vector<16x128xf32>
    %30 = math.tanh %29 : vector<16x128xf32>
    %31 = arith.mulf %21, %30 : vector<16x128xf32>
    %cst_21 = arith.constant dense<0.000000e+00> : vector<16x64xf32>
    %32 = tpu.matmul %31, %0, %cst_21 {dimension_numbers = #tpu.dot_dimension_numbers<[1], [0], [0], [1], [0, 0, 1, 1], [], []>} : vector<16x128xf32>, vector<128x64xf32>, vector<16x64xf32> -> vector<16x64xf32>
    %33 = vector.shape_cast %32 : vector<16x64xf32> to vector<16x1x64xf32>
    %c0_22 = arith.constant 0 : index
    %c0_23 = arith.constant 0 : index
    %c0_24 = arith.constant 0 : index
    %34 = vector.load %arg9[%c0_22, %c0_23, %c0_24] : memref<16x16x64xf32, #tpu.memory_space<vmem>>, vector<16x16x64xf32>
    %35 = vector.broadcast %33 : vector<16x1x64xf32> to vector<16x16x64xf32>
    %36 = arith.mulf %35, %34 : vector<16x16x64xf32>
    %cst_25 = arith.constant dense<0.000000e+00> : vector<16x64xf32>
    %37 = vector.multi_reduction <add>, %36, %cst_25 [0] : vector<16x16x64xf32> to vector<16x64xf32>
    %cst_26 = arith.constant dense<0.000000e+00> : vector<16x128xf32>
    %38 = tpu.matmul %37, %1, %cst_26 {dimension_numbers = #tpu.dot_dimension_numbers<[1], [0], [0], [1], [0, 0, 1, 1], [], []>} : vector<16x64xf32>, vector<64x128xf32>, vector<16x128xf32> -> vector<16x128xf32>
    %c0_27 = arith.constant 0 : index
    %c0_28 = arith.constant 0 : index
    %39 = vector.load %arg10[%c0_27, %c0_28] : memref<16x16xf32, #tpu.memory_space<vmem>>, vector<16x16xf32>
    %cst_29 = arith.constant dense<0.000000e+00> : vector<16x128xf32>
    %40 = tpu.matmul %39, %31, %cst_29 {dimension_numbers = #tpu.dot_dimension_numbers<[1], [0], [0], [1], [0, 0, 1, 1], [], []>} : vector<16x16xf32>, vector<16x128xf32>, vector<16x128xf32> -> vector<16x128xf32>
    %41 = arith.addf %38, %40 : vector<16x128xf32>
    %c0_30 = arith.constant 0 : index
    %c0_31 = arith.constant 0 : index
    %42 = vector.load %arg11[%c0_30, %c0_31] : memref<16x1xf32, #tpu.memory_space<vmem>>, vector<16x1xf32>
    %43 = vector.broadcast %42 : vector<16x1xf32> to vector<16x128xf32>
    %44 = arith.addf %41, %43 : vector<16x128xf32>
    %c0_32 = arith.constant 0 : index
    %c0_33 = arith.constant 0 : index
    %45 = vector.load %arg12[%c0_32, %c0_33] : memref<128x16xf32, #tpu.memory_space<vmem>>, vector<128x16xf32>
    %cst_34 = arith.constant dense<0.000000e+00> : vector<128x128xf32>
    %46 = tpu.matmul %45, %44, %cst_34 {dimension_numbers = #tpu.dot_dimension_numbers<[1], [0], [0], [1], [0, 0, 1, 1], [], []>} : vector<128x16xf32>, vector<16x128xf32>, vector<128x128xf32> -> vector<128x128xf32>
    %c0_35 = arith.constant 0 : index
    %c0_36 = arith.constant 0 : index
    %47 = vector.load %arg13[%c0_35, %c0_36] : memref<128x1xf32, #tpu.memory_space<vmem>>, vector<128x1xf32>
    %48 = vector.broadcast %47 : vector<128x1xf32> to vector<128x128xf32>
    %49 = arith.addf %46, %48 : vector<128x128xf32>
    %cst_37 = arith.constant 0.000000e+00 : f32
    %50 = vector.broadcast %cst_37 : f32 to vector<128x128xf32>
    %51 = arith.maximumf %49, %50 : vector<128x128xf32>
    %52 = math.absf %49 : vector<128x128xf32>
    %cst_38 = arith.constant 0.000000e+00 : f32
    %53 = vector.broadcast %cst_38 : f32 to vector<128x128xf32>
    %54 = arith.subf %53, %52 : vector<128x128xf32>
    %55 = math.exp %54 : vector<128x128xf32>
    %56 = math.log1p %55 : vector<128x128xf32>
    %57 = arith.addf %51, %56 : vector<128x128xf32>
    %58 = math.tanh %57 : vector<128x128xf32>
    %59 = arith.mulf %49, %58 : vector<128x128xf32>
    %c0_39 = arith.constant 0 : index
    %c0_40 = arith.constant 0 : index
    %60 = vector.load %arg14[%c0_39, %c0_40] : memref<1x128xf32, #tpu.memory_space<vmem>>, vector<1x128xf32>
    %cst_41 = arith.constant dense<0.000000e+00> : vector<1x128xf32>
    %61 = tpu.matmul %60, %59, %cst_41 {dimension_numbers = #tpu.dot_dimension_numbers<[1], [0], [0], [1], [0, 0, 1, 1], [], []>} : vector<1x128xf32>, vector<128x128xf32>, vector<1x128xf32> -> vector<1x128xf32>
    %c0_42 = arith.constant 0 : index
    %c0_43 = arith.constant 0 : index
    %62 = vector.load %arg15[%c0_42, %c0_43] : memref<1x1xf32, #tpu.memory_space<vmem>>, vector<1x1xf32>
    %63 = vector.broadcast %62 : vector<1x1xf32> to vector<1x128xf32>
    %64 = arith.addf %61, %63 : vector<1x128xf32>
    %c0_44 = arith.constant 0 : index
    %c0_45 = arith.constant 0 : index
    %65 = vector.load %arg16[%c0_44, %c0_45] : memref<1x128xf32, #tpu.memory_space<vmem>>, vector<1x128xf32>
    tpu.vector_store %arg16[%c0_44, %c0_45], %64 {strides = array<i32>} : memref<1x128xf32, #tpu.memory_space<vmem>>, vector<1x128xf32>,
    return
  }
  func.func @transform_0(%arg0: i32) -> (i32, i32) {
    %c0_i32 = arith.constant 0 : i32
    %c0_i32_0 = arith.constant 0 : i32
    %c0_i32_1 = arith.constant 0 : i32
    return %c0_i32, %c0_i32_0 : i32, i32
  }
  func.func @transform_1(%arg0: i32) -> (i32, i32) {
    %c0_i32 = arith.constant 0 : i32
    %c0_i32_0 = arith.constant 0 : i32
    %c0_i32_1 = arith.constant 0 : i32
    return %c0_i32, %c0_i32_0 : i32, i32
  }
  func.func @transform_2(%arg0: i32) -> (i32, i32) {
    %c0_i32 = arith.constant 0 : i32
    %c0_i32_0 = arith.constant 0 : i32
    %c0_i32_1 = arith.constant 0 : i32
    return %c0_i32, %c0_i32_0 : i32, i32
  }
  func.func @transform_3(%arg0: i32) -> (i32, i32) {
    %c0_i32 = arith.constant 0 : i32
    %c0_i32_0 = arith.constant 0 : i32
    %c0_i32_1 = arith.constant 0 : i32
    return %c0_i32, %c0_i32_0 : i32, i32
  }
  func.func @transform_4(%arg0: i32) -> (i32, i32) {
    %c0_i32 = arith.constant 0 : i32
    %c0_i32_0 = arith.constant 0 : i32
    %c0_i32_1 = arith.constant 0 : i32
    return %c0_i32, %c0_i32_0 : i32, i32
  }
  func.func @transform_5(%arg0: i32) -> (i32, i32, i32) {
    %c0_i32 = arith.constant 0 : i32
    %c0_i32_0 = arith.constant 0 : i32
    %c0_i32_1 = arith.constant 0 : i32
    %c0_i32_2 = arith.constant 0 : i32
    return %c0_i32, %c0_i32_0, %c0_i32_1 : i32, i32, i32
  }
  func.func @transform_6(%arg0: i32) -> (i32, i32) {
    %c0_i32 = arith.constant 0 : i32
    %c0_i32_0 = arith.constant 0 : i32
    %c0_i32_1 = arith.constant 0 : i32
    return %c0_i32, %c0_i32_0 : i32, i32
  }
  func.func @transform_7(%arg0: i32) -> (i32, i32) {
    %c0_i32 = arith.constant 0 : i32
    %c0_i32_0 = arith.constant 0 : i32
    %c0_i32_1 = arith.constant 0 : i32
    return %c0_i32, %c0_i32_0 : i32, i32
  }
  func.func @transform_8(%arg0: i32) -> (i32, i32, i32) {
    %c0_i32 = arith.constant 0 : i32
    %c0_i32_0 = arith.constant 0 : i32
    %c0_i32_1 = arith.constant 0 : i32
    %c0_i32_2 = arith.constant 0 : i32
    return %c0_i32, %c0_i32_0, %c0_i32_1 : i32, i32, i32
  }
  func.func @transform_9(%arg0: i32) -> (i32, i32) {
    %c0_i32 = arith.constant 0 : i32
    %c0_i32_0 = arith.constant 0 : i32
    %c0_i32_1 = arith.constant 0 : i32
    return %c0_i32, %c0_i32_0 : i32, i32
  }
  func.func @transform_10(%arg0: i32) -> (i32, i32) {
    %c0_i32 = arith.constant 0 : i32
    %c0_i32_0 = arith.constant 0 : i32
    %c0_i32_1 = arith.constant 0 : i32
    return %c0_i32, %c0_i32_0 : i32, i32
  }
  func.func @transform_11(%arg0: i32) -> (i32, i32) {
    %c0_i32 = arith.constant 0 : i32
    %c0_i32_0 = arith.constant 0 : i32
    %c0_i32_1 = arith.constant 0 : i32
    return %c0_i32, %c0_i32_0 : i32, i32
  }
  func.func @transform_12(%arg0: i32) -> (i32, i32) {
    %c0_i32 = arith.constant 0 : i32
    %c0_i32_0 = arith.constant 0 : i32
    %c0_i32_1 = arith.constant 0 : i32
    return %c0_i32, %c0_i32_0 : i32, i32
  }
  func.func @transform_13(%arg0: i32) -> (i32, i32) {
    %c0_i32 = arith.constant 0 : i32
    %c0_i32_0 = arith.constant 0 : i32
    %c0_i32_1 = arith.constant 0 : i32
    return %c0_i32, %c0_i32_0 : i32, i32
  }
  func.func @transform_14(%arg0: i32) -> (i32, i32) {
    %c0_i32 = arith.constant 0 : i32
    %c0_i32_0 = arith.constant 0 : i32
    %c0_i32_1 = arith.constant 0 : i32
    return %c0_i32, %c0_i32_0 : i32, i32
  }
  func.func @transform_15(%arg0: i32) -> (i32, i32) {
    %c0_i32 = arith.constant 0 : i32
    %c0_i32_0 = arith.constant 0 : i32
    %c0_i32_1 = arith.constant 0 : i32
    return %c0_i32, %c0_i32_0 : i32, i32
  }
}

</mosaic_0001>

<bundles_post_ra>
// kernel: wno1d_forward.1
= control target key start
LH: loop header
LB: loop body
LE: loop exit
PB: predicated region body
PF: predicated region fallthrough
CT: control target
= control target key end

     0   :  { %s3594_s0 = inlined_call_operand.vmem [shape: f32[1,128], index: 0, kind: input, shape index: {}]   ;;  %s3595_s1 = inlined_call_operand.vmem [shape: f32[16,1], index: 1, kind: input, shape index: {}]   ;;  %s3596_s2 = inlined_call_operand.vmem [shape: f32[16,128], index: 2, kind: input, shape index: {}]   ;;  %s3597_s3 = inlined_call_operand.vmem [shape: f32[128,64], index: 3, kind: input, shape index: {}]   ;;  %s3598_s4 = inlined_call_operand.hbm [shape: f32[64,128], index: 4, kind: input, shape index: {}]   ;;  %s3599_s5 = inlined_call_operand.vmem [shape: f32[16,16,64], index: 5, kind: input, shape index: {}]   ;;  %s3600_s6 = inlined_call_operand.hbm [shape: f32[16,16], index: 6, kind: input, shape index: {}]   ;;  %s3601_s7 = inlined_call_operand.vmem [shape: f32[16,1], index: 7, kind: input, shape index: {}]   ;;  %s3602_s8 = inlined_call_operand.vmem [shape: f32[16,16,64], index: 8, kind: input, shape index: {}]   ;;  %s3603_s9 = inlined_call_operand.hbm [shape: f32[16,16], index: 9, kind: input, shape index: {}]   ;;  %s3604_s10 = inlined_call_operand.vmem [shape: f32[16,1], index: 10, kind: input, shape index: {}]   ;;  %s3605_s11 = inlined_call_operand.vmem [shape: f32[128,16], index: 11, kind: input, shape index: {}]   ;;  %s3606_s12 = inlined_call_operand.vmem [shape: f32[128,1], index: 12, kind: input, shape index: {}]   ;;  %s3607_s13 = inlined_call_operand.hbm [shape: f32[1,128], index: 13, kind: input, shape index: {}]   ;;  %s3608_s14 = inlined_call_operand.<no memory space> [shape: f32[1,1], index: 14, kind: input, shape index: {}]   ;;  %s3609_s15 = inlined_call_operand.vmem [shape: f32[1,128], index: 15, kind: output, shape index: {}]  }
   0x1   :  { %v20_v0 = vstv %s3608_s14 }
   0x2   :  { %21 = vst [vmem:[#allocation2] sm:$0x1] %v20_v0 }
   0x3   :  { %22 = vsyncpa [#allocation4], 0 }
   0x4   :  { %23 = vsyncpa [#allocation6], 0 }
   0x5   :  { %24 = vsyncpa [#allocation9], 0  ;;  %s2634_s20 = smov [#allocation5]   ;;  %s2635_s22 = smov [#allocation3]  }
   0x6   :  { %s52_s21 = sshll.u32 %s2634_s20, 4  ;;  %s38_s23 = sshll.u32 %s2635_s22, 4  ;;  %s53_s21 = int_to_ptr.vmem [resolvable:$true] %s52_s21  ;;  %s2728_s23 = int_to_ptr.vmem [resolvable:$true] %s38_s23 }
   0x7   :  { %s2540_s26 = scalar_lea.hbm %s3600_s6, 256 }
   0x8   :  { %p2541_p0 = scmp.ne.s32.totalorder %s3600_s6, %s2540_s26  ;;  %p2544_p1 = scmp.lt.u32.totalorder %s2540_s26, %s3600_s6 }
   0xa   :  { %p2546_p2 = pnand %p2544_p1, %p2541_p0 }
   0xc   :  { %2549 = shalt.err (!%p2546_p2)
}
   0xd   :  { %s2550_s30 = scalar_lea.vmem %s53_s21, 256  ;;  %p2555_p4 = scmp.lt.s32.totalorder %s53_s21, %s53_s21 }
   0xe   :  { %p2551_p3 = scmp.ne.s32.totalorder %s53_s21, %s2550_s30  ;;  %p2556_p5 = scmp.lt.s32.totalorder %s2550_s30, %s2550_s30 }
  0x10   :  { %p2557_p6 = por %p2556_p5, %p2555_p4 }
  0x12   :  { %p2558_p7 = pnand %p2557_p6, %p2551_p3 }
  0x14   :  { %2561 = shalt.err (!%p2558_p7)
}
  0x15   :  { %s2636_s16 = smov 128   ;;  %s2637_s17 = smov 8  }
  0x16   :  { %58 = dma.hbm_to_vmem [thread:$0]  %s3600_s6, 256, %s53_s21, [#allocation6], %s2636_s16, %s2636_s16, %s2637_s17  }
  0x17   :  { %s2562_s24 = scalar_lea.hbm %s3598_s4, 1024 }
  0x18   :  { %p2563_p8 = scmp.ne.s32.totalorder %s3598_s4, %s2562_s24  ;;  %p2566_p9 = scmp.lt.u32.totalorder %s2562_s24, %s3598_s4 }
  0x1a   :  { %p2568_p10 = pnand %p2566_p9, %p2563_p8 }
  0x1c   :  { %2571 = shalt.err (!%p2568_p10)
}
  0x1d   :  { %s2572_s14 = scalar_lea.vmem %s2728_s23, 1024  ;;  %p2577_p12 = scmp.lt.s32.totalorder %s2728_s23, %s2728_s23 }
  0x1e   :  { %p2573_p11 = scmp.ne.s32.totalorder %s2728_s23, %s2572_s14  ;;  %p2578_p13 = scmp.lt.s32.totalorder %s2572_s14, %s2572_s14 }
  0x20   :  { %p2579_p0 = por %p2578_p13, %p2577_p12 }
  0x22   :  { %p2580_p1 = pnand %p2579_p0, %p2573_p11 }
  0x24   :  { %2583 = shalt.err (!%p2580_p1)
}
  0x25   :  { %44 = dma.hbm_to_vmem [thread:$0]  %s3598_s4, 1024, %s2728_s23, [#allocation4], %s2636_s16, %s2636_s16, %s2637_s17  }
  0x26   :  { %s2638_s29 = smov [#allocation7]   ;;  %s2639_s18 = smov [#allocation8]  }
  0x27   :  { %s68_s30 = sshll.u32 %s2638_s29, 4  ;;  %s87_s19 = sshll.u32 %s2639_s18, 4  ;;  %s69_s30 = int_to_ptr.vmem [resolvable:$true] %s68_s30  ;;  %s88_s19 = int_to_ptr.vmem [resolvable:$true] %s87_s19 }
  0x28   :  { %s2584_s24 = scalar_lea.hbm %s3603_s9, 256 }
  0x29   :  { %p2585_p2 = scmp.ne.s32.totalorder %s3603_s9, %s2584_s24  ;;  %p2588_p3 = scmp.lt.u32.totalorder %s2584_s24, %s3603_s9 }
  0x2b   :  { %p2590_p4 = pnand %p2588_p3, %p2585_p2 }
  0x2d   :  { %2593 = shalt.err (!%p2590_p4)
}
  0x2e   :  { %s2594_s4 = scalar_lea.vmem %s69_s30, 256  ;;  %p2599_p6 = scmp.lt.s32.totalorder %s69_s30, %s69_s30 }
  0x2f   :  { %p2595_p5 = scmp.ne.s32.totalorder %s69_s30, %s2594_s4  ;;  %p2600_p7 = scmp.lt.s32.totalorder %s2594_s4, %s2594_s4 }
  0x31   :  { %p2601_p8 = por %p2600_p7, %p2599_p6 }
  0x33   :  { %p2602_p9 = pnand %p2601_p8, %p2595_p5 }
  0x35   :  { %2605 = shalt.err (!%p2602_p9)
}
  0x36   :  { %74 = dma.hbm_to_vmem [thread:$0]  %s3603_s9, 256, %s69_s30, [#allocation6], %s2636_s16, %s2636_s16, %s2637_s17  }
  0x37   :  { %s2606_s29 = scalar_lea.hbm %s3607_s13, 16 }
  0x38   :  { %p2607_p10 = scmp.ne.s32.totalorder %s3607_s13, %s2606_s29  ;;  %p2610_p11 = scmp.lt.u32.totalorder %s2606_s29, %s3607_s13 }
  0x3a   :  { %p2612_p12 = pnand %p2610_p11, %p2607_p10 }
  0x3c   :  { %2615 = shalt.err (!%p2612_p12)
}
  0x3d   :  { %s2616_s25 = scalar_lea.vmem %s88_s19, 16  ;;  %s2620_s26 = scalar_lea.vmem %s88_s19, 32 }
  0x3e   :  { %p2617_p13 = scmp.ne.s32.totalorder %s88_s19, %s2616_s25  ;;  %p2621_p0 = scmp.lt.s32.totalorder %s88_s19, %s88_s19 }
  0x3f   :  { %p2622_p1 = scmp.lt.s32.totalorder %s2620_s26, %s2616_s25 }
  0x41   :  { %p2623_p2 = por %p2622_p1, %p2621_p0 }
  0x43   :  { %p2624_p3 = pnand %p2623_p2, %p2617_p13 }
  0x45   :  { %2627 = shalt.err (!%p2624_p3)
}
  0x46   :  { %90 = dma.hbm_to_vmem [thread:$0]  %s3607_s13, 16, %s88_s19, [#allocation9]  }
  0x47   :  { %2628 = dma.done.wait [#allocation4], 1024  }
  0x48   :  { %2629 = vsyncadd [#allocation4], 4294966272 }
  0x49   :  { %2630 = dma.done.wait [#allocation6], 512  }
  0x4a   :  { %2631 = vsyncadd [#allocation6], 4294966784 }
  0x4b   :  { %2632 = dma.done.wait [#allocation9], 16  }
  0x4c   :  { %2633 = vsyncadd [#allocation9], 4294967280  ;;  %v2640_v1 = vmov 0   ;;  %v129_v2 = vld [vmem:[%s3595_s1] sm:$0xff]  ;;  %v130_v3 = vld [vmem:[%s3595_s1 + $0x8] sm:$0xff]  ;;  %vm538_vm0 = vcmask 130048  }
  0x4d   :  { %2430 = vset.pattern.permute.xlu0 %v2640_v1  ;;  %2431 = vset.pattern.permute.xlu1 %v2640_v1  ;;  %v105_v4 = vld [vmem:[%s3597_s3] sm:$0xff]  ;;  %v106_v5 = vld [vmem:[%s3597_s3 + $0x8] sm:$0xff]  ;;  %v107_v6 = vld [vmem:[%s3597_s3 + $0x10] sm:$0xff]  ;;  %vm473_vm1 = vcmask 523264   ;;  %vm2643_vm4 = vmmov 0  }
  0x4e   :  { %134 = vperm.xlu0 %2430, %v129_v2   ;;  %v2807_v7 = vpack.c.bf16 %v106_v5, %v105_v4  ;;  %v108_v8 = vld [vmem:[%s3597_s3 + $0x18] sm:$0xff]  ;;  %v1294_v9 = vld [vmem:[%s3604_s10] sm:$0xff]  ;;  %v110_v12 = vld [vmem:[%s3597_s3 + $0x28] sm:$0xff] }
  0x4f   :  { %v2815_v10 = vpack.c.bf16 %v108_v8, %v107_v6  ;;  %v109_v11 = vld [vmem:[%s3597_s3 + $0x20] sm:$0xff]  ;;  %v111_v15 = vld [vmem:[%s3597_s3 + $0x30] sm:$0xff]  ;;  %v112_v16 = vld [vmem:[%s3597_s3 + $0x38] sm:$0xff] }
  0x50   :  { %2284 = vmatprep.subr.bf16.mxu0 %v2807_v7  ;;  %v2826_v13 = vpack.c.bf16 %v110_v12, %v109_v11  ;;  %v1324_v14 = vld [vmem:[%s3606_s12] sm:$0xff]  ;;  %v2839_v17 = vpack.c.bf16 %v112_v16, %v111_v15  ;;  %v1326_v18 = vld [vmem:[%s3606_s12 + $0x10] sm:$0xff]  ;;  %v114_v20 = vld [vmem:[%s3597_s3 + $0x48] sm:$0xff]  ;;  %v2641_v11 = vmov 1966171168  }
  0x51   :  { %2286 = vmatpush3.bf16.msra.mxu0 %v2807_v7  ;;  %v113_v19 = vld [vmem:[%s3597_s3 + $0x40] sm:$0xff]  ;;  %v115_v23 = vld [vmem:[%s3597_s3 + $0x50] sm:$0xff]  ;;  %v116_v24 = vld [vmem:[%s3597_s3 + $0x58] sm:$0xff]  ;;  %v233_v12 = vunpack.c.l.s4 %v2641_v11 }
  0x52   :  { %139 = vperm.xlu0 %2430, %v130_v3   ;;  %2288 = vmatprep.subr.bf16.mxu0 %v2815_v10  ;;  %v2852_v21 = vpack.c.bf16 %v114_v20, %v113_v19  ;;  %v1328_v22 = vld [vmem:[%s3606_s12 + $0x20] sm:$0xff]  ;;  %v2865_v25 = vpack.c.bf16 %v116_v24, %v115_v23  ;;  %v1330_v26 = vld [vmem:[%s3606_s12 + $0x30] sm:$0xff]  ;;  %v118_v28 = vld [vmem:[%s3597_s3 + $0x68] sm:$0xff] }
  0x53   :  { %v117_v27 = vld [vmem:[%s3597_s3 + $0x60] sm:$0xff]  ;;  %v119_v31 = vld [vmem:[%s3597_s3 + $0x70] sm:$0xff]  ;;  %v120_v32 = vld [vmem:[%s3597_s3 + $0x78] sm:$0xff]  ;;  %v234_v15 = vunpack.c.0.s8 %v233_v12 }
  0x54   :  { %v2878_v29 = vpack.c.bf16 %v118_v28, %v117_v27  ;;  %v1332_v30 = vld [vmem:[%s3606_s12 + $0x40] sm:$0xff]  ;;  %v2891_v33 = vpack.c.bf16 %v120_v32, %v119_v31  ;;  %v1334_v34 = vld [vmem:[%s3606_s12 + $0x50] sm:$0xff]  ;;  %v151_v43 = vld [vmem:[%s3596_s2 + $0x8] sm:$0xff] }
  0x55   :  { %2290 = vmatpush3.bf16.msra.mxu0 %v2815_v10  ;;  %v1336_v35 = vld [vmem:[%s3606_s12 + $0x60] sm:$0xff]  ;;  %v1338_v36 = vld [vmem:[%s3606_s12 + $0x70] sm:$0xff]  ;;  %v702_v63 = vld [vmem:[%s3601_s7 + $0x8] sm:$0xff] }
  0x56   :  { %1298 = vperm.xlu0 %2430, %v1294_v9   ;;  %2292 = vmatprep.subr.bf16.mxu0 %v2826_v13  ;;  %v1886_v37 = vld [vmem:[#allocation2] sm:$0x1]  ;;  %v121_v48 = vld [vmem:[#allocation3] sm:$0xff]  ;;  %v122_v49 = vld [vmem:[#allocation3 + $0x8] sm:$0xff] }
  0x57   :  { %v1974_v38 = vld [vmem:[%s3594_s0] ss:$0 sm:$0xff]  ;;  %v2914_v50 = vpack.c.bf16 %v122_v49, %v121_v48  ;;  %v536_v51 = vld [vmem:[#allocation5] sm:$0xff]  ;;  %v537_v52 = vld [vmem:[#allocation5 + $0x8] sm:$0xff] }
  0x58   :  { %v150_v40 = vld [vmem:[%s3596_s2] sm:$0xff]  ;;  %v123_v53 = vld [vmem:[#allocation3 + $0x10] sm:$0xff]  ;;  %2137 = vmatprep.mubr.msk.f32.mxu1 %vm538_vm0, %v536_v51  ;;  %v126_v56 = vld [vmem:[#allocation3 + $0x28] sm:$0xff] }
  0x59   :  { %2294 = vmatpush3.bf16.msra.mxu0 %v2826_v13  ;;  %v124_v54 = vld [vmem:[#allocation3 + $0x18] sm:$0xff]  ;;  %v125_v55 = vld [vmem:[#allocation3 + $0x20] sm:$0xff]  ;;  %v127_v59 = vld [vmem:[#allocation3 + $0x30] sm:$0xff] }
  0x5a   :  { %1342 = vperm.xlu0 %2430, %v1324_v14   ;;  %2296 = vmatprep.subr.bf16.mxu0 %v2839_v17  ;;  %v2919_v57 = vpack.c.bf16 %v124_v54, %v123_v53  ;;  %v2923_v58 = vpack.c.bf16 %v126_v56, %v125_v55  ;;  %v128_v60 = vld [vmem:[#allocation3 + $0x38] sm:$0xff]  ;;  %v1295_v0 = vld [vmem:[%s3604_s10 + $0x8] sm:$0xff]  ;;  %v235_v14 = vlaneseq  ;;  %v335_v54 = vld [vmem:[%s3599_s5 + $0x30] sm:$0xff] }
  0x5b   :  { %v2927_v61 = vpack.c.bf16 %v128_v60, %v127_v59  ;;  %v701_v62 = vld [vmem:[%s3601_s7] sm:$0xff]  ;;  %v1325_v1 = vld [vmem:[%s3606_s12 + $0x8] sm:$0xff]  ;;  %v1327_v2 = vld [vmem:[%s3606_s12 + $0x18] sm:$0xff] }
  0x5c   :  { %705 = vperm.xlu1 %2431, %v701_v62   ;;  %v1329_v3 = vld [vmem:[%s3606_s12 + $0x28] sm:$0xff]  ;;  %v1331_v4 = vld [vmem:[%s3606_s12 + $0x38] sm:$0xff]  ;;  %v236_v16 = vshrl.u32 %v235_v14, 7  ;;  %v339_v12 = vld [vmem:[%s3599_s5 + $0x50] sm:$0xff] }
  0x5d   :  { %2298 = vmatpush3.bf16.msra.mxu0 %v2839_v17  ;;  %v1333_v5 = vld [vmem:[%s3606_s12 + $0x48] sm:$0xff]  ;;  %v1335_v6 = vld [vmem:[%s3606_s12 + $0x58] sm:$0xff] }
  0x5e   :  { %1352 = vperm.xlu0 %2430, %v1326_v18   ;;  %2300 = vmatprep.subr.bf16.mxu0 %v2852_v21  ;;  %v1337_v8 = vld [vmem:[%s3606_s12 + $0x68] sm:$0xff]  ;;  %v1339_v9 = vld [vmem:[%s3606_s12 + $0x78] sm:$0xff]  ;;  %v2966_v19 = vsub.s32 %v234_v15, %v236_v16 }
  0x5f   :  { %v334_v53 = vld [vmem:[%s3599_s5 + $0x28] sm:$0xff]  ;;  %v336_v55 = vld [vmem:[%s3599_s5 + $0x38] sm:$0xff] }
  0x60   :  { %710 = vperm.xlu1 %2431, %v702_v63   ;;  %v338_v11 = vld [vmem:[%s3599_s5 + $0x48] sm:$0xff] }
  0x61   :  { %2302 = vmatpush3.bf16.msra.mxu0 %v2852_v21 }
  0x62   :  { %1362 = vperm.xlu0 %2430, %v1328_v22   ;;  %2304 = vmatprep.subr.bf16.mxu0 %v2865_v25 }
  0x64   :  { %1303 = vperm.xlu1 %2431, %v1295_v0  }
  0x65   :  { %2306 = vmatpush3.bf16.msra.mxu0 %v2865_v25 }
  0x66   :  { %1372 = vperm.xlu0 %2430, %v1330_v26   ;;  %2308 = vmatprep.subr.bf16.mxu0 %v2878_v29 }
  0x68   :  { %1347 = vperm.xlu1 %2431, %v1325_v1  }
  0x69   :  { %2310 = vmatpush3.bf16.msra.mxu0 %v2878_v29 }
  0x6a   :  { %1382 = vperm.xlu0 %2430, %v1332_v30   ;;  %2312 = vmatprep.subr.bf16.mxu0 %v2891_v33  ;;  %v2972_v30 = vsub.s32 0, %v236_v16 }
  0x6c   :  { %1357 = vperm.xlu1 %2431, %v1327_v2   ;;  %v337_v2 = vld [vmem:[%s3599_s5 + $0x40] sm:$0xff] }
  0x6d   :  { %2314 = vmatpush3.bf16.msra.mxu0 %v2891_v33 }
  0x6e   :  { %1392 = vperm.xlu0 %2430, %v1334_v34  }
  0x70   :  { %1367 = vperm.xlu1 %2431, %v1329_v3  }
  0x72   :  { %1402 = vperm.xlu0 %2430, %v1336_v35  }
  0x74   :  { %1377 = vperm.xlu1 %2431, %v1331_v4  }
  0x76   :  { %1412 = vperm.xlu0 %2430, %v1338_v36  }
  0x78   :  { %1387 = vperm.xlu1 %2431, %v1333_v5  }
  0x7a   :  { %1889 = vperm.xlu0 %2430, %v1886_v37   ;;  %v329_v37 = vld [vmem:[%s3599_s5] sm:$0xff] }
  0x7c   :  { %1397 = vperm.xlu1 %2431, %v1335_v6  }
  0x80   :  { %1407 = vperm.xlu1 %2431, %v1337_v8  }
  0x84   :  { %1417 = vperm.xlu1 %2431, %v1339_v9  }
  0xcd   :  { %v135_v39 = vpop.permute.xlu0 %134 }
  0xce   :  { %v148_v41 = vmul.f32 %v1974_v38, %v135_v39 }
  0xd0   :  { %v152_v42 = vadd.f32 %v150_v40, %v148_v41 }
  0xd1   :  { %v140_v44 = vpop.permute.xlu0 %139 }
  0xd2   :  { %v149_v45 = vmul.f32 %v1974_v38, %v140_v44  ;;  %2130 = vmatprep.mubr.f32.mxu0 %v152_v42  ;;  %v331_v38 = vld [vmem:[%s3599_s5 + $0x10] sm:$0xff]  ;;  %v330_v44 = vld [vmem:[%s3599_s5 + $0x8] sm:$0xff] }
  0xd4   :  { %v153_v46 = vadd.f32 %v151_v43, %v149_v45  ;;  %v332_v45 = vld [vmem:[%s3599_s5 + $0x18] sm:$0xff] }
  0xd6   :  { %2131 = vmatmul.mubr.f32.vlgmr.msra.gmra.mrb[0].mxu0 %v153_v46  ;;  %v2315_v47 = vpack.c.bf16 %v153_v46, %v152_v42  ;;  %v333_v46 = vld [vmem:[%s3599_s5 + $0x20] sm:$0xff] }
  0xd8   :  { %2316 = vmatprep.subr.bf16.mxu1 %v2315_v47 }
  0xd9   :  { %2318 = vmatpush3.bf16.msra.mxu1 %v2315_v47 }
  0xda   :  { %2320 = vmatprep.subr.bf16.mxu1 %v2914_v50 }
  0xdc   :  { %2138 = vmatmul.mubr.msk.f32.vlgmr.msra.gmra.mrb[0].mxu1 %vm538_vm0, %v537_v52 }
  0xdd   :  { %2322 = vmatpush3.bf16.msra.mxu1 %v2914_v50 }
  0xde   :  { %2324 = vmatprep.subr.bf16.mxu1 %v2919_v57 }
  0xe1   :  { %2326 = vmatpush3.bf16.msra.mxu1 %v2919_v57 }
  0xe2   :  { %2328 = vmatprep.subr.bf16.mxu1 %v2923_v58 }
  0xe5   :  { %2330 = vmatpush3.bf16.msra.mxu1 %v2923_v58 }
  0xe6   :  { %2332 = vmatprep.subr.bf16.mxu1 %v2927_v61 }
  0xe9   :  { %2334 = vmatpush3.bf16.msra.mxu1 %v2927_v61 }
  0xea   :  { %2336 = vmatprep.subr.bf16.mxu1 %v2807_v7 }
 0x1a9   :  { %v2132_v18 = vpop.f32.mrb[0].mxu0 }
 0x1aa   :  { %v220_v20 = vpop.f32.mrb[1].mxu0  ;;  %v280_v32 = vcombine.high %v2132_v18, %v2132_v18  ;;  %v287_v42 = vrot.slane %v2132_v18, %v2966_v19 }
 0x1ab   :  { %v238_v22 = vrot.slane %v220_v20, %v2966_v19  ;;  %v231_v23 = vcombine.high %v220_v20, %v220_v20 }
 0x1ac   :  { %v2997_v51 = vrot.slane %v280_v32, %v2966_v19  ;;  %v295_v63 = vcombine.high %v287_v42, %v287_v42  ;;  %v303_v0 = vrot.slane %v287_v42, %v2966_v19 }
 0x1ad   :  { %v246_v24 = vcombine.high %v238_v22, %v238_v22  ;;  %v245_v26 = vrot.slane %v231_v23, %v2966_v19  ;;  %v254_v27 = vrot.slane %v238_v22, %v2966_v19 }
 0x1ae   :  { %v296_v9 = vcombine.high %v2997_v51, %v2997_v51 }
 0x1af   :  { %v268_v28 = vrot.slane %v246_v24, %v2966_v19  ;;  %v247_v31 = vcombine.high %v245_v26, %v245_v26  ;;  %v276_v34 = vcombine.high %v254_v27, %v254_v27  ;;  %v261_v35 = vrot.slane %v245_v26, %v2966_v19  ;;  %v340_v26 = vld [vmem:[%s3599_s5 + $0x58] sm:$0xff] }
 0x1b0   :  { %v364_v39 = vrot.slane %v254_v27, %v2972_v30  ;;  %v317_v24 = vrot.slane %v295_v63, %v2966_v19  ;;  %v341_v27 = vld [vmem:[%s3599_s5 + $0x60] sm:$0xff] }
 0x1b1   :  { %v278_v36 = vcombine.high %v268_v28, %v268_v28  ;;  %v368_v40 = vrot.slane %v268_v28, %v2972_v30  ;;  %v372_v41 = vrot.slane %v276_v34, %v2972_v30  ;;  %v275_v43 = vrot.slane %v247_v31, %v2966_v19 }
 0x1b2   :  { %v441_v48 = vmul.f32 %v364_v39, %v329_v37  ;;  %v277_v52 = vcombine.high %v261_v35, %v261_v35  ;;  %v380_v56 = vrot.slane %v261_v35, %v2972_v30  ;;  %v442_v59 = vmul.f32 %v364_v39, %v330_v44 }
 0x1b3   :  { %v376_v47 = vrot.slane %v278_v36, %v2972_v30  ;;  %v443_v49 = vmul.f32 %v368_v40, %v331_v38  ;;  %v444_v60 = vmul.f32 %v368_v40, %v332_v45  ;;  %v445_v62 = vmul.f32 %v372_v41, %v333_v46  ;;  %v342_v40 = vld [vmem:[%s3599_s5 + $0x68] sm:$0xff] }
 0x1b4   :  { %v279_v1 = vcombine.high %v275_v43, %v275_v43  ;;  %v384_v3 = vrot.slane %v275_v43, %v2972_v30  ;;  %v446_v4 = vmul.f32 %v372_v41, %v334_v53  ;;  %v474_v6 = vsel %vm473_vm1, %v441_v48, 0.0  ;;  %v343_v41 = vld [vmem:[%s3599_s5 + $0x70] sm:$0xff]  ;;  %v344_v53 = vld [vmem:[%s3599_s5 + $0x78] sm:$0xff] }
 0x1b5   :  { %v447_v5 = vmul.f32 %v376_v47, %v335_v54  ;;  %v475_v8 = vsel %vm473_vm1, %v443_v49, 0.0  ;;  %v388_v14 = vrot.slane %v277_v52, %v2972_v30  ;;  %v448_v15 = vmul.f32 %v376_v47, %v336_v55  ;;  %v345_v49 = vld [vmem:[%s3599_s5 + $0x80] sm:$0xff] }
 0x1b6   :  { %v476_v16 = vadd.f32 %v475_v8, %v474_v6  ;;  %v449_v18 = vmul.f32 %v380_v56, %v337_v2  ;;  %v477_v20 = vsel %vm473_vm1, %v445_v62, 0.0  ;;  %v505_v22 = vsel %vm473_vm1, %v442_v59, 0.0 }
 0x1b7   :  { %v506_v23 = vsel %vm473_vm1, %v444_v60, 0.0  ;;  %v392_v28 = vrot.slane %v279_v1, %v2972_v30  ;;  %v450_v34 = vmul.f32 %v380_v56, %v338_v11  ;;  %v451_v35 = vmul.f32 %v384_v3, %v339_v12  ;;  %v346_v56 = vld [vmem:[%s3599_s5 + $0x88] sm:$0xff]  ;;  %v347_v1 = vld [vmem:[%s3599_s5 + $0x90] sm:$0xff] }
 0x1b8   :  { %v478_v31 = vadd.f32 %v477_v20, %v476_v16  ;;  %v507_v32 = vadd.f32 %v506_v23, %v505_v22  ;;  %v479_v36 = vsel %vm473_vm1, %v447_v5, 0.0  ;;  %v508_v37 = vsel %vm473_vm1, %v446_v4, 0.0 }
 0x1b9   :  { %v325_v38 = vcombine.high %v303_v0, %v303_v0  ;;  %v396_v39 = vrot.slane %v303_v0, %v2972_v30  ;;  %v452_v44 = vmul.f32 %v384_v3, %v340_v26  ;;  %v453_v45 = vmul.f32 %v388_v14, %v341_v27  ;;  %v351_v27 = vld [vmem:[%s3599_s5 + $0xb0] sm:$0xff] }
 0x1ba   :  { %v480_v42 = vadd.f32 %v479_v36, %v478_v31  ;;  %v509_v43 = vadd.f32 %v508_v37, %v507_v32  ;;  %v481_v46 = vsel %vm473_vm1, %v449_v18, 0.0  ;;  %v510_v47 = vsel %vm473_vm1, %v448_v15, 0.0 }
 0x1bb   :  { %v327_v48 = vcombine.high %v317_v24, %v317_v24  ;;  %v400_v52 = vrot.slane %v317_v24, %v2972_v30  ;;  %v454_v59 = vmul.f32 %v388_v14, %v342_v40  ;;  %v455_v60 = vmul.f32 %v392_v28, %v343_v41  ;;  %v349_v14 = vld [vmem:[%s3599_s5 + $0xa0] sm:$0xff] }
 0x1bc   :  { %v482_v54 = vadd.f32 %v481_v46, %v480_v42  ;;  %v511_v55 = vadd.f32 %v510_v47, %v509_v43  ;;  %v483_v62 = vsel %vm473_vm1, %v451_v35, 0.0  ;;  %v512_v63 = vsel %vm473_vm1, %v450_v34, 0.0  ;;  %v353_v40 = vld [vmem:[%s3599_s5 + $0xc0] sm:$0xff] }
 0x1bd   :  { %v310_v0 = vrot.slane %v2997_v51, %v2966_v19  ;;  %v404_v2 = vrot.slane %v325_v38, %v2972_v30  ;;  %v457_v5 = vmul.f32 %v396_v39, %v345_v49  ;;  %v456_v6 = vmul.f32 %v392_v28, %v344_v53  ;;  %v348_v51 = vld [vmem:[%s3599_s5 + $0x98] sm:$0xff]  ;;  %v355_v49 = vld [vmem:[%s3599_s5 + $0xd0] sm:$0xff] }
 0x1be   :  { %v484_v3 = vadd.f32 %v483_v62, %v482_v54  ;;  %v513_v4 = vadd.f32 %v512_v63, %v511_v55  ;;  %v485_v8 = vsel %vm473_vm1, %v453_v45, 0.0  ;;  %v514_v11 = vsel %vm473_vm1, %v452_v44, 0.0  ;;  %v356_v62 = vld [vmem:[%s3599_s5 + $0xd8] sm:$0xff]  ;;  %v357_v63 = vld [vmem:[%s3599_s5 + $0xe0] sm:$0xff] }
 0x1bf   :  { %v324_v12 = vrot.slane %v296_v9, %v2966_v19  ;;  %v458_v15 = vmul.f32 %v396_v39, %v346_v56  ;;  %v408_v20 = vrot.slane %v327_v48, %v2972_v30  ;;  %v459_v22 = vmul.f32 %v400_v52, %v347_v1  ;;  %v350_v9 = vld [vmem:[%s3599_s5 + $0xa8] sm:$0xff]  ;;  %v352_v39 = vld [vmem:[%s3599_s5 + $0xb8] sm:$0xff] }
 0x1c0   :  { %v486_v16 = vadd.f32 %v485_v8, %v484_v3  ;;  %v515_v18 = vadd.f32 %v514_v11, %v513_v4  ;;  %v487_v23 = vsel %vm473_vm1, %v455_v60, 0.0  ;;  %v516_v24 = vsel %vm473_vm1, %v454_v59, 0.0  ;;  %v354_v48 = vld [vmem:[%s3599_s5 + $0xc8] sm:$0xff]  ;;  %v359_v11 = vld [vmem:[%s3599_s5 + $0xf0] sm:$0xff] }
 0x1c1   :  { %v326_v26 = vcombine.high %v310_v0, %v310_v0  ;;  %v412_v28 = vrot.slane %v310_v0, %v2972_v30  ;;  %v460_v34 = vmul.f32 %v400_v52, %v348_v51  ;;  %v461_v35 = vmul.f32 %v404_v2, %v349_v14  ;;  %v358_v8 = vld [vmem:[%s3599_s5 + $0xe8] sm:$0xff] }
 0x1c2   :  { %v488_v31 = vadd.f32 %v487_v23, %v486_v16  ;;  %v517_v32 = vadd.f32 %v516_v24, %v515_v18  ;;  %v489_v36 = vsel %vm473_vm1, %v457_v5, 0.0  ;;  %v518_v37 = vsel %vm473_vm1, %v456_v6, 0.0 }
 0x1c3   :  { %v328_v38 = vcombine.high %v324_v12, %v324_v12  ;;  %v416_v41 = vrot.slane %v324_v12, %v2972_v30  ;;  %v462_v44 = vmul.f32 %v404_v2, %v350_v9  ;;  %v463_v45 = vmul.f32 %v408_v20, %v351_v27 }
 0x1c4   :  { %v490_v42 = vadd.f32 %v489_v36, %v488_v31  ;;  %v519_v43 = vadd.f32 %v518_v37, %v517_v32  ;;  %v491_v46 = vsel %vm473_vm1, %v459_v22, 0.0  ;;  %v520_v47 = vsel %vm473_vm1, %v458_v15, 0.0 }
 0x1c5   :  { %v420_v52 = vrot.slane %v326_v26, %v2972_v30  ;;  %v464_v55 = vmul.f32 %v408_v20, %v352_v39  ;;  %v465_v56 = vmul.f32 %v412_v28, %v353_v40  ;;  %v493_v59 = vsel %vm473_vm1, %v461_v35, 0.0  ;;  %v360_v20 = vld [vmem:[%s3599_s5 + $0xf8] sm:$0xff] }
 0x1c6   :  { %v521_v53 = vadd.f32 %v520_v47, %v519_v43  ;;  %v492_v54 = vadd.f32 %v491_v46, %v490_v42  ;;  %v522_v60 = vsel %vm473_vm1, %v460_v34, 0.0  ;;  %v424_v0 = vrot.slane %v328_v38, %v2972_v30 }
 0x1c7   :  { %v466_v3 = vmul.f32 %v412_v28, %v354_v48  ;;  %v467_v4 = vmul.f32 %v416_v41, %v355_v49  ;;  %v495_v5 = vsel %vm473_vm1, %v463_v45, 0.0  ;;  %v524_v6 = vsel %vm473_vm1, %v462_v44, 0.0 }
 0x1c8   :  { %v523_v1 = vadd.f32 %v522_v60, %v521_v53  ;;  %v494_v2 = vadd.f32 %v493_v59, %v492_v54  ;;  %v468_v14 = vmul.f32 %v416_v41, %v356_v62  ;;  %v469_v15 = vmul.f32 %v420_v52, %v357_v63 }
 0x1c9   :  { %v497_v16 = vsel %vm473_vm1, %v465_v56, 0.0  ;;  %v526_v18 = vsel %vm473_vm1, %v464_v55, 0.0  ;;  %v470_v24 = vmul.f32 %v420_v52, %v358_v8  ;;  %v528_v26 = vsel %vm473_vm1, %v466_v3, 0.0 }
 0x1ca   :  { %v496_v12 = vadd.f32 %v495_v5, %v494_v2  ;;  %v525_v51 = vadd.f32 %v524_v6, %v523_v1  ;;  %v471_v9 = vmul.f32 %v424_v0, %v359_v11  ;;  %v499_v27 = vsel %vm473_vm1, %v467_v4, 0.0 }
 0x1cb   :  { %v472_v32 = vmul.f32 %v424_v0, %v360_v20  ;;  %v530_v34 = vsel %vm473_vm1, %v468_v14, 0.0  ;;  %v501_v35 = vsel %vm473_vm1, %v469_v15, 0.0  ;;  %v532_v38 = vsel %vm473_vm1, %v470_v24, 0.0 }
 0x1cc   :  { %v498_v22 = vadd.f32 %v497_v16, %v496_v12  ;;  %v527_v23 = vadd.f32 %v526_v18, %v525_v51  ;;  %v503_v39 = vsel %vm473_vm1, %v471_v9, 0.0 }
 0x1cd   :  { %v534_v42 = vsel %vm473_vm1, %v472_v32, 0.0 }
 0x1ce   :  { %v500_v28 = vadd.f32 %v499_v27, %v498_v22  ;;  %v529_v31 = vadd.f32 %v528_v26, %v527_v23  ;;  %v1130_v22 = vld [vmem:[#allocation7] sm:$0xff]  ;;  %v1131_v23 = vld [vmem:[#allocation7 + $0x8] sm:$0xff] }
 0x1cf   :  { %2198 = vmatprep.mubr.msk.f32.mxu0 %vm538_vm0, %v1130_v22 }
 0x1d0   :  { %v502_v36 = vadd.f32 %v501_v35, %v500_v28  ;;  %v531_v37 = vadd.f32 %v530_v34, %v529_v31 }
 0x1d2   :  { %v504_v40 = vadd.f32 %v503_v39, %v502_v36  ;;  %v533_v41 = vadd.f32 %v532_v38, %v531_v37  ;;  %v926_v37 = vld [vmem:[%s3602_s8 + $0x10] sm:$0xff] }
 0x1d4   :  { %2156 = vmatprep.mubr.msk.f32.mxu1 %vm473_vm1, %v504_v40  ;;  %v535_v43 = vadd.f32 %v534_v42, %v533_v41 }
 0x1d6   :  { %2157 = vmatmul.mubr.msk.f32.vlgmr.msra.gmra.mrb[0].mxu1 %vm473_vm1, %v535_v43  ;;  %v925_v43 = vld [vmem:[%s3602_s8 + $0x8] sm:$0xff] }
 0x1d7   :  { %2338 = vmatpush3.bf16.msra.mxu1 %v2807_v7  ;;  %v706_v7 = vpop.permute.xlu1 %705 }
 0x1d8   :  { %2340 = vmatprep.subr.bf16.mxu1 %v2815_v10 }
 0x1db   :  { %2342 = vmatpush3.bf16.msra.mxu1 %v2815_v10  ;;  %v711_v10 = vpop.permute.xlu1 %710 }
 0x1dc   :  { %2344 = vmatprep.subr.bf16.mxu1 %v2826_v13 }
 0x1df   :  { %2346 = vmatpush3.bf16.msra.mxu1 %v2826_v13 }
 0x1e0   :  { %2348 = vmatprep.subr.bf16.mxu1 %v2839_v17 }
 0x1e3   :  { %2350 = vmatpush3.bf16.msra.mxu1 %v2839_v17 }
 0x1e4   :  { %2352 = vmatprep.subr.bf16.mxu1 %v2852_v21 }
 0x1e7   :  { %2354 = vmatpush3.bf16.msra.mxu1 %v2852_v21 }
 0x1e8   :  { %2356 = vmatprep.subr.bf16.mxu1 %v2865_v25 }
 0x1eb   :  { %2358 = vmatpush3.bf16.msra.mxu1 %v2865_v25 }
 0x1ec   :  { %2360 = vmatprep.subr.bf16.mxu1 %v2878_v29 }
 0x1ef   :  { %2362 = vmatpush3.bf16.msra.mxu1 %v2878_v29 }
 0x1f0   :  { %2364 = vmatprep.subr.bf16.mxu1 %v2891_v33 }
 0x1f3   :  { %2366 = vmatpush3.bf16.msra.mxu1 %v2891_v33 }
 0x2a9   :  { %v2158_v13 = vpop.f32.mrb[0].mxu1 }
 0x2aa   :  { %v714_v17 = vadd.f32 %v2158_v13, %v711_v10  ;;  %v692_v44 = vpop.f32.mrb[1].mxu1  ;;  %v928_v10 = vld [vmem:[%s3602_s8 + $0x20] sm:$0xff] }
 0x2ab   :  { %v713_v45 = vadd.f32 %v706_v7, %v692_v44  ;;  %v927_v7 = vld [vmem:[%s3602_s8 + $0x18] sm:$0xff] }
 0x2ac   :  { %v718_v46 = vand.u32 2147483647, %v714_v17  ;;  %v716_v3 = vmax.f32 %v714_v17, 0.0 }
 0x2ad   :  { %v717_v21 = vand.u32 2147483647, %v713_v45  ;;  %v715_v8 = vmax.f32 %v713_v45, 0.0 }
 0x2ae   :  { %v720_v47 = vsub.f32 0.0, %v718_v46 }
 0x2af   :  { %v719_v48 = vsub.f32 0.0, %v717_v21  ;;  %v929_v21 = vld [vmem:[%s3602_s8 + $0x28] sm:$0xff] }
 0x2b0   :  { %v723_v49 = vmul.f32 1.442695, %v720_v47  ;;  %v930_v47 = vld [vmem:[%s3602_s8 + $0x30] sm:$0xff] }
 0x2b1   :  { %v721_v25 = vmul.f32 1.442695, %v719_v48  ;;  %v931_v48 = vld [vmem:[%s3602_s8 + $0x38] sm:$0xff] }
 0x2b2   :  { %2432 = vpow2.f32 %v723_v49 }
 0x2b3   :  { %2434 = vpow2.f32 %v721_v25 }
 0x2bc   :  { %v2433_v52 = vpop.eup %2432 }
 0x2bd   :  { %v2435_v29 = vpop.eup %2434  ;;  %v734_v53 = vadd.f32 1.0, %v2433_v52  ;;  %v737_v33 = vmul.f32 -0.5, %v2433_v52  ;;  %v740_v59 = vand.u32 2147483647, %v2433_v52 }
 0x2be   :  { %v725_v54 = vadd.f32 1.0, %v2435_v29  ;;  %v728_v55 = vmul.f32 -0.5, %v2435_v29  ;;  %v731_v62 = vand.u32 2147483647, %v2435_v29 }
 0x2bf   :  { %2436 = vlog2.f32 %v734_v53  ;;  %v738_v56 = vadd.f32 1.0, %v737_v33  ;;  %vm741_vm2 = vcmp.lt.f32.partialorder %v740_v59, 0.0004427343 }
 0x2c0   :  { %2438 = vlog2.f32 %v725_v54  ;;  %v729_v60 = vadd.f32 1.0, %v728_v55  ;;  %vm732_vm3 = vcmp.lt.f32.partialorder %v731_v62, 0.0004427343  ;;  %v932_v55 = vld [vmem:[%s3602_s8 + $0x40] sm:$0xff] }
 0x2c1   :  { %v739_v2 = vmul.f32 %v2433_v52, %v738_v56 }
 0x2c2   :  { %v730_v5 = vmul.f32 %v2435_v29, %v729_v60 }
 0x2c9   :  { %v2437_v63 = vpop.eup %2436 }
 0x2ca   :  { %v2439_v0 = vpop.eup %2438  ;;  %v736_v1 = vmul.f32 0.6931472, %v2437_v63 }
 0x2cb   :  { %v727_v4 = vmul.f32 0.6931472, %v2439_v0 }
 0x2cc   :  { %v742_v6 = vsel %vm741_vm2, %v739_v2, %v736_v1  ;;  %v933_v1 = vld [vmem:[%s3602_s8 + $0x48] sm:$0xff]  ;;  %v934_v2 = vld [vmem:[%s3602_s8 + $0x50] sm:$0xff] }
 0x2cd   :  { %v744_v11 = vadd.f32 %v742_v6, %v716_v3  ;;  %v733_v12 = vsel %vm732_vm3, %v730_v5, %v727_v4 }
 0x2ce   :  { %v743_v51 = vadd.f32 %v733_v12, %v715_v8 }
 0x2cf   :  { %2440 = vtanh.f32 %v744_v11 }
 0x2d0   :  { %2442 = vtanh.f32 %v743_v51 }
 0x2d9   :  { %v2441_v14 = vpop.eup %2440 }
 0x2da   :  { %v2443_v15 = vpop.eup %2442  ;;  %v748_v16 = vmul.f32 %v2441_v14, %v714_v17  ;;  %v935_v14 = vld [vmem:[%s3602_s8 + $0x58] sm:$0xff] }
 0x2db   :  { %v747_v18 = vmul.f32 %v2443_v15, %v713_v45  ;;  %v936_v15 = vld [vmem:[%s3602_s8 + $0x60] sm:$0xff] }
 0x2dd   :  { %2191 = vmatprep.mubr.f32.mxu1 %v747_v18  ;;  %v2367_v20 = vpack.c.bf16 %v748_v16, %v747_v18 }
 0x2de   :  { %2192 = vmatmul.mubr.f32.vlgmr.msra.gmra.mrb[2].mxu1 %v748_v16 }
 0x2df   :  { %2368 = vmatprep.subr.bf16.mxu0 %v2367_v20 }
 0x2e0   :  { %2370 = vmatpush3.bf16.msra.mxu0 %v2367_v20 }
 0x2e1   :  { %2372 = vmatprep.subr.bf16.mxu0 %v2914_v50 }
 0x2e3   :  { %2199 = vmatmul.mubr.msk.f32.vlgmr.msra.gmra.mrb[2].mxu0 %vm538_vm0, %v1131_v23 }
 0x2e4   :  { %2374 = vmatpush3.bf16.msra.mxu0 %v2914_v50 }
 0x2e5   :  { %2376 = vmatprep.subr.bf16.mxu0 %v2919_v57 }
 0x2e8   :  { %2378 = vmatpush3.bf16.msra.mxu0 %v2919_v57 }
 0x2e9   :  { %2380 = vmatprep.subr.bf16.mxu0 %v2923_v58 }
 0x2ec   :  { %2382 = vmatpush3.bf16.msra.mxu0 %v2923_v58 }
 0x2ed   :  { %2384 = vmatprep.subr.bf16.mxu0 %v2927_v61 }
 0x2f0   :  { %2386 = vmatpush3.bf16.msra.mxu0 %v2927_v61  ;;  %v924_v61 = vld [vmem:[%s3602_s8] sm:$0xff] }
 0x3b1   :  { %v2193_v24 = vpop.f32.mrb[2].mxu1 }
 0x3b2   :  { %v815_v26 = vpop.f32.mrb[3].mxu1  ;;  %v875_v34 = vcombine.high %v2193_v24, %v2193_v24  ;;  %v882_v41 = vrot.slane %v2193_v24, %v2966_v19 }
 0x3b3   :  { %v833_v9 = vrot.slane %v815_v26, %v2966_v19  ;;  %v826_v27 = vcombine.high %v815_v26, %v815_v26 }
 0x3b4   :  { %v3185_v45 = vrot.slane %v875_v34, %v2966_v19  ;;  %v890_v53 = vcombine.high %v882_v41, %v882_v41  ;;  %v898_v54 = vrot.slane %v882_v41, %v2966_v19  ;;  %v941_v41 = vld [vmem:[%s3602_s8 + $0x88] sm:$0xff] }
 0x3b5   :  { %v841_v28 = vcombine.high %v833_v9, %v833_v9  ;;  %v840_v50 = vrot.slane %v826_v27, %v2966_v19  ;;  %v849_v31 = vrot.slane %v833_v9, %v2966_v19 }
 0x3b6   :  { %v891_v0 = vcombine.high %v3185_v45, %v3185_v45  ;;  %v912_v51 = vrot.slane %v890_v53, %v2966_v19  ;;  %v920_v9 = vcombine.high %v898_v54, %v898_v54  ;;  %v991_v27 = vrot.slane %v898_v54, %v2972_v30 }
 0x3b7   :  { %v863_v57 = vrot.slane %v841_v28, %v2966_v19  ;;  %v842_v32 = vcombine.high %v840_v50, %v840_v50  ;;  %v871_v35 = vcombine.high %v849_v31, %v849_v31  ;;  %v856_v58 = vrot.slane %v840_v50, %v2966_v19  ;;  %v937_v28 = vld [vmem:[%s3602_s8 + $0x68] sm:$0xff]  ;;  %v938_v50 = vld [vmem:[%s3602_s8 + $0x70] sm:$0xff] }
 0x3b8   :  { %v959_v38 = vrot.slane %v849_v31, %v2972_v30  ;;  %v1053_v53 = vmul.f32 %v991_v27, %v941_v41  ;;  %v954_v41 = vld [vmem:[%s3602_s8 + $0xf0] sm:$0xff] }
 0x3b9   :  { %v873_v36 = vcombine.high %v863_v57, %v863_v57  ;;  %v963_v39 = vrot.slane %v863_v57, %v2972_v30  ;;  %v967_v40 = vrot.slane %v871_v35, %v2972_v30  ;;  %v870_v42 = vrot.slane %v842_v32, %v2966_v19 }
 0x3ba   :  { %v1036_v17 = vmul.f32 %v959_v38, %v924_v61  ;;  %v872_v46 = vcombine.high %v856_v58, %v856_v58  ;;  %v975_v49 = vrot.slane %v856_v58, %v2972_v30  ;;  %v1037_v25 = vmul.f32 %v959_v38, %v925_v43  ;;  %v940_v61 = vld [vmem:[%s3602_s8 + $0x80] sm:$0xff]  ;;  %v939_v38 = vld [vmem:[%s3602_s8 + $0x78] sm:$0xff] }
 0x3bb   :  { %v971_v13 = vrot.slane %v873_v36, %v2972_v30  ;;  %v1038_v44 = vmul.f32 %v963_v39, %v926_v37  ;;  %v1039_v52 = vmul.f32 %v963_v39, %v927_v7  ;;  %v1040_v29 = vmul.f32 %v967_v40, %v928_v10 }
 0x3bc   :  { %v874_v33 = vcombine.high %v870_v42, %v870_v42  ;;  %v979_v56 = vrot.slane %v870_v42, %v2972_v30  ;;  %v1041_v59 = vmul.f32 %v967_v40, %v929_v21  ;;  %v1068_v62 = vsel %vm473_vm1, %v1036_v17, 0.0  ;;  %v942_v17 = vld [vmem:[%s3602_s8 + $0x90] sm:$0xff] }
 0x3bd   :  { %v1042_v60 = vmul.f32 %v971_v13, %v930_v47  ;;  %v1069_v63 = vsel %vm473_vm1, %v1038_v44, 0.0  ;;  %v983_v3 = vrot.slane %v872_v46, %v2972_v30  ;;  %v1043_v4 = vmul.f32 %v971_v13, %v931_v48 }
 0x3be   :  { %v1070_v5 = vadd.f32 %v1069_v63, %v1068_v62  ;;  %v1044_v6 = vmul.f32 %v975_v49, %v932_v55  ;;  %v1071_v8 = vsel %vm473_vm1, %v1040_v29, 0.0  ;;  %v1099_v11 = vsel %vm473_vm1, %v1037_v25, 0.0  ;;  %v944_v29 = vld [vmem:[%s3602_s8 + $0xa0] sm:$0xff]  ;;  %v946_v63 = vld [vmem:[%s3602_s8 + $0xb0] sm:$0xff] }
 0x3bf   :  { %v1100_v12 = vsel %vm473_vm1, %v1039_v52, 0.0  ;;  %v987_v16 = vrot.slane %v874_v33, %v2972_v30  ;;  %v1045_v22 = vmul.f32 %v975_v49, %v933_v1  ;;  %v1046_v23 = vmul.f32 %v979_v56, %v934_v2 }
 0x3c0   :  { %v1072_v18 = vadd.f32 %v1071_v8, %v1070_v5  ;;  %v1101_v20 = vadd.f32 %v1100_v12, %v1099_v11  ;;  %v1073_v24 = vsel %vm473_vm1, %v1042_v60, 0.0  ;;  %v1102_v26 = vsel %vm473_vm1, %v1041_v59, 0.0  ;;  %v947_v11 = vld [vmem:[%s3602_s8 + $0xb8] sm:$0xff]  ;;  %v948_v12 = vld [vmem:[%s3602_s8 + $0xc0] sm:$0xff] }
 0x3c1   :  { %v1047_v32 = vmul.f32 %v979_v56, %v935_v14  ;;  %v1048_v34 = vmul.f32 %v983_v3, %v936_v15  ;;  %v1075_v35 = vsel %vm473_vm1, %v1044_v6, 0.0  ;;  %v1104_v58 = vsel %vm473_vm1, %v1043_v4, 0.0 }
 0x3c2   :  { %v1074_v31 = vadd.f32 %v1073_v24, %v1072_v18  ;;  %v1103_v57 = vadd.f32 %v1102_v26, %v1101_v20  ;;  %v922_v36 = vcombine.high %v912_v51, %v912_v51  ;;  %v995_v37 = vrot.slane %v912_v51, %v2972_v30  ;;  %v950_v24 = vld [vmem:[%s3602_s8 + $0xd0] sm:$0xff] }
 0x3c3   :  { %v1049_v42 = vmul.f32 %v983_v3, %v937_v28  ;;  %v1050_v43 = vmul.f32 %v987_v16, %v938_v50  ;;  %v1077_v7 = vsel %vm473_vm1, %v1046_v23, 0.0  ;;  %v1106_v10 = vsel %vm473_vm1, %v1045_v22, 0.0  ;;  %v949_v23 = vld [vmem:[%s3602_s8 + $0xc8] sm:$0xff] }
 0x3c4   :  { %v1076_v39 = vadd.f32 %v1075_v35, %v1074_v31  ;;  %v1105_v40 = vadd.f32 %v1104_v58, %v1103_v57  ;;  %v905_v13 = vrot.slane %v3185_v45, %v2966_v19  ;;  %v999_v44 = vrot.slane %v920_v9, %v2972_v30  ;;  %v943_v45 = vld [vmem:[%s3602_s8 + $0x98] sm:$0xff] }
 0x3c5   :  { %v1052_v47 = vmul.f32 %v991_v27, %v940_v61  ;;  %v1051_v48 = vmul.f32 %v987_v16, %v939_v38  ;;  %v1079_v49 = vsel %vm473_vm1, %v1048_v34, 0.0  ;;  %v1108_v25 = vsel %vm473_vm1, %v1047_v32, 0.0  ;;  %v951_v32 = vld [vmem:[%s3602_s8 + $0xd8] sm:$0xff]  ;;  %v952_v34 = vld [vmem:[%s3602_s8 + $0xe0] sm:$0xff] }
 0x3c6   :  { %v1078_v46 = vadd.f32 %v1077_v7, %v1076_v39  ;;  %v1107_v21 = vadd.f32 %v1106_v10, %v1105_v40  ;;  %v919_v52 = vrot.slane %v891_v0, %v2966_v19  ;;  %v1003_v55 = vrot.slane %v922_v36, %v2972_v30  ;;  %v945_v19 = vld [vmem:[%s3602_s8 + $0xa8] sm:$0xff] }
 0x3c7   :  { %v1054_v56 = vmul.f32 %v995_v37, %v942_v17  ;;  %v1081_v59 = vsel %vm473_vm1, %v1050_v43, 0.0  ;;  %v1110_v60 = vsel %vm473_vm1, %v1049_v42, 0.0  ;;  %v921_v62 = vcombine.high %v905_v13, %v905_v13  ;;  %v953_v40 = vld [vmem:[%s3602_s8 + $0xe8] sm:$0xff] }
 0x3c8   :  { %v1080_v54 = vadd.f32 %v1079_v49, %v1078_v46  ;;  %v1109_v33 = vadd.f32 %v1108_v25, %v1107_v21  ;;  %v1007_v0 = vrot.slane %v905_v13, %v2972_v30  ;;  %v1055_v3 = vmul.f32 %v995_v37, %v943_v45 }
 0x3c9   :  { %v1056_v4 = vmul.f32 %v999_v44, %v944_v29  ;;  %v1083_v5 = vsel %vm473_vm1, %v1052_v47, 0.0  ;;  %v1112_v6 = vsel %vm473_vm1, %v1051_v48, 0.0  ;;  %v923_v8 = vcombine.high %v919_v52, %v919_v52 }
 0x3ca   :  { %v1082_v1 = vadd.f32 %v1081_v59, %v1080_v54  ;;  %v1111_v2 = vadd.f32 %v1110_v60, %v1109_v33  ;;  %v1011_v51 = vrot.slane %v919_v52, %v2972_v30  ;;  %v1057_v16 = vmul.f32 %v999_v44, %v945_v19  ;;  %v955_v44 = vld [vmem:[%s3602_s8 + $0xf8] sm:$0xff] }
 0x3cb   :  { %v1058_v18 = vmul.f32 %v1003_v55, %v946_v63  ;;  %v1085_v20 = vsel %vm473_vm1, %v1054_v56, 0.0  ;;  %v1114_v22 = vsel %vm473_vm1, %v1053_v53, 0.0  ;;  %v1015_v26 = vrot.slane %v921_v62, %v2972_v30 }
 0x3cc   :  { %v1084_v14 = vadd.f32 %v1083_v5, %v1082_v1  ;;  %v1113_v15 = vadd.f32 %v1112_v6, %v1111_v2  ;;  %v1059_v28 = vmul.f32 %v1003_v55, %v947_v11  ;;  %v1060_v50 = vmul.f32 %v1007_v0, %v948_v12  ;;  %v1304_v1 = vpop.permute.xlu1 %1303  ;;  %v1309_v11 = vld [vmem:[%s3605_s11 + $0x8] sm:$0xff]  ;;  %v1310_v12 = vld [vmem:[%s3605_s11 + $0x10] sm:$0xff] }
 0x3cd   :  { %v1087_v31 = vsel %vm473_vm1, %v1056_v4, 0.0  ;;  %v1116_v57 = vsel %vm473_vm1, %v1055_v3, 0.0  ;;  %v1019_v35 = vrot.slane %v923_v8, %v2972_v30  ;;  %v1061_v61 = vmul.f32 %v1007_v0, %v949_v23  ;;  %v1308_v0 = vld [vmem:[%s3605_s11] sm:$0xff]  ;;  %v1299_v3 = vpop.permute.xlu0 %1298  ;;  %v1318_v23 = vld [vmem:[%s3605_s11 + $0x50] sm:$0xff] }
 0x3ce   :  { %v1115_v9 = vadd.f32 %v1114_v22, %v1113_v15  ;;  %v1086_v27 = vadd.f32 %v1085_v20, %v1084_v14  ;;  %v1062_v37 = vmul.f32 %v1011_v51, %v950_v24  ;;  %v1089_v38 = vsel %vm473_vm1, %v1058_v18, 0.0  ;;  %v1312_v14 = vld [vmem:[%s3605_s11 + $0x20] sm:$0xff]  ;;  %v1313_v15 = vld [vmem:[%s3605_s11 + $0x28] sm:$0xff]  ;;  %v1315_v18 = vld [vmem:[%s3605_s11 + $0x38] sm:$0xff] }
 0x3cf   :  { %v1118_v39 = vsel %vm473_vm1, %v1057_v16, 0.0  ;;  %v1063_v7 = vmul.f32 %v1011_v51, %v951_v32  ;;  %v1064_v10 = vmul.f32 %v1015_v26, %v952_v34  ;;  %v1091_v13 = vsel %vm473_vm1, %v1060_v50, 0.0  ;;  %v1311_v51 = vld [vmem:[%s3605_s11 + $0x18] sm:$0xff]  ;;  %v1314_v16 = vld [vmem:[%s3605_s11 + $0x30] sm:$0xff]  ;;  %v1316_v20 = vld [vmem:[%s3605_s11 + $0x40] sm:$0xff] }
 0x3d0   :  { %v1117_v58 = vadd.f32 %v1116_v57, %v1115_v9  ;;  %v1088_v36 = vadd.f32 %v1087_v31, %v1086_v27  ;;  %v1120_v17 = vsel %vm473_vm1, %v1059_v28, 0.0  ;;  %v1065_v47 = vmul.f32 %v1015_v26, %v953_v40  ;;  %v1317_v22 = vld [vmem:[%s3605_s11 + $0x48] sm:$0xff]  ;;  %v1319_v24 = vld [vmem:[%s3605_s11 + $0x58] sm:$0xff]  ;;  %v1320_v26 = vld [vmem:[%s3605_s11 + $0x60] sm:$0xff]  ;;  %v1348_v57 = vpop.permute.xlu1 %1347 }
 0x3d1   :  { %v1122_v48 = vsel %vm473_vm1, %v1061_v61, 0.0  ;;  %v1066_v49 = vmul.f32 %v1019_v35, %v954_v41  ;;  %v1093_v25 = vsel %vm473_vm1, %v1062_v37, 0.0  ;;  %v1067_v29 = vmul.f32 %v1019_v35, %v955_v44  ;;  %v1321_v9 = vld [vmem:[%s3605_s11 + $0x68] sm:$0xff]  ;;  %v1322_v27 = vld [vmem:[%s3605_s11 + $0x70] sm:$0xff]  ;;  %v1323_v28 = vld [vmem:[%s3605_s11 + $0x78] sm:$0xff]  ;;  %v1343_v32 = vpop.permute.xlu0 %1342 }
 0x3d2   :  { %v1090_v42 = vadd.f32 %v1089_v38, %v1088_v36  ;;  %v1119_v43 = vadd.f32 %v1118_v39, %v1117_v58  ;;  %v1124_v53 = vsel %vm473_vm1, %v1063_v7, 0.0  ;;  %v1095_v54 = vsel %vm473_vm1, %v1064_v10, 0.0 }
 0x3d3   :  { %v1126_v56 = vsel %vm473_vm1, %v1065_v47, 0.0  ;;  %v1097_v59 = vsel %vm473_vm1, %v1066_v49, 0.0  ;;  %v1128_v19 = vsel %vm473_vm1, %v1067_v29, 0.0  ;;  %v2642_v50 = vmov 0.0|0.0  }
 0x3d4   :  { %v1092_v46 = vadd.f32 %v1091_v13, %v1090_v42  ;;  %v1121_v21 = vadd.f32 %v1120_v17, %v1119_v43  ;;  %2391 = vmatprep.subr.bf16.mxu1 %v2642_v50  ;;  %v2644_v31 = vmov 0.0   ;;  %v1358_v34 = vpop.permute.xlu1 %1357 }
 0x3d5   :  { %2280 = vmatprep.mubr.msk.f32.mxu1 %vm2643_vm4, %v2644_v31  ;;  %v1353_v58 = vpop.permute.xlu0 %1352 }
 0x3d6   :  { %v1094_v52 = vadd.f32 %v1093_v25, %v1092_v46  ;;  %v1123_v45 = vadd.f32 %v1122_v48, %v1121_v21 }
 0x3d8   :  { %v1096_v33 = vadd.f32 %v1095_v54, %v1094_v52  ;;  %v1125_v55 = vadd.f32 %v1124_v53, %v1123_v45  ;;  %v1368_v7 = vpop.permute.xlu1 %1367 }
 0x3d9   :  { %v1363_v17 = vpop.permute.xlu0 %1362 }
 0x3da   :  { %v1098_v60 = vadd.f32 %v1097_v59, %v1096_v33  ;;  %v1127_v62 = vadd.f32 %v1126_v56, %v1125_v55 }
 0x3dc   :  { %2217 = vmatprep.mubr.msk.f32.mxu0 %vm473_vm1, %v1098_v60  ;;  %v1129_v63 = vadd.f32 %v1128_v19, %v1127_v62  ;;  %v1378_v33 = vpop.permute.xlu1 %1377 }
 0x3dd   :  { %v1373_v60 = vpop.permute.xlu0 %1372 }
 0x3de   :  { %2218 = vmatmul.mubr.msk.f32.vlgmr.msra.gmra.mrb[2].mxu0 %vm473_vm1, %v1129_v63 }
 0x3df   :  { %2224 = vmatprep.mubr.msk.f32.mxu0 %vm538_vm0, %v1308_v0 }
 0x4b1   :  { %v2219_v2 = vpop.f32.mrb[2].mxu0 }
 0x4b2   :  { %v1307_v4 = vadd.f32 %v2219_v2, %v1304_v1  ;;  %v1285_v5 = vpop.f32.mrb[3].mxu0 }
 0x4b3   :  { %v1306_v6 = vadd.f32 %v1299_v3, %v1285_v5 }
 0x4b5   :  { %v2387_v8 = vpack.c.bf16 %v1307_v4, %v1306_v6 }
 0x4b7   :  { %2388 = vmatprep.subr.bf16.mxu0 %v2387_v8 }
 0x4b8   :  { %2390 = vmatpush3.bf16.msra.mxu0 %v2387_v8 }
 0x4bb   :  { %2225 = vmatmul.mubr.msk.f32.vlgmr.msra.gmra.mrb[4].mxu0 %vm538_vm0, %v1309_v11  ;;  %v1388_v11 = vpop.permute.xlu1 %1387 }
 0x4bc   :  { %2227 = vmatprep.mubr.msk.f32.mxu0 %vm538_vm0, %v1310_v12 }
 0x4bf   :  { %2228 = vmatmul.mubr.msk.f32.gmra.mrb[6].mxu0 %vm538_vm0, %v1311_v51 }
 0x4c0   :  { %2230 = vmatprep.mubr.msk.f32.mxu0 %vm538_vm0, %v1312_v14 }
 0x4c3   :  { %2231 = vmatmul.mubr.msk.f32.gmra.mrb[8].mxu0 %vm538_vm0, %v1313_v15 }
 0x4c4   :  { %2233 = vmatprep.mubr.msk.f32.mxu0 %vm538_vm0, %v1314_v16 }
 0x4c7   :  { %2234 = vmatmul.mubr.msk.f32.gmra.mrb[10].mxu0 %vm538_vm0, %v1315_v18 }
 0x4c8   :  { %2236 = vmatprep.mubr.msk.f32.mxu0 %vm538_vm0, %v1316_v20 }
 0x4cb   :  { %2237 = vmatmul.mubr.msk.f32.gmra.mrb[12].mxu0 %vm538_vm0, %v1317_v22 }
 0x4cc   :  { %2239 = vmatprep.mubr.msk.f32.mxu0 %vm538_vm0, %v1318_v23 }
 0x4cf   :  { %2240 = vmatmul.mubr.msk.f32.gmra.mrb[14].mxu0 %vm538_vm0, %v1319_v24 }
 0x4d0   :  { %2242 = vmatprep.mubr.msk.f32.mxu0 %vm538_vm0, %v1320_v26  ;;  %v1383_v26 = vpop.permute.xlu0 %1382 }
 0x4d3   :  { %2243 = vmatmul.mubr.msk.f32.gmra.mrb[16].mxu0 %vm538_vm0, %v1321_v9 }
 0x4d4   :  { %2245 = vmatprep.mubr.msk.f32.mxu0 %vm538_vm0, %v1322_v27 }
 0x4d7   :  { %2246 = vmatmul.mubr.msk.f32.gmra.mrb[18].mxu0 %vm538_vm0, %v1323_v28 }
 0x58e   :  { %v2226_v35 = vpop.f32.mrb[4].mxu0 }
 0x58f   :  { %v3386_v36 = vadd.f32 %v2226_v35, %v1348_v57  ;;  %v1534_v61 = vpop.f32.mrb[5].mxu0 }
 0x590   :  { %v3388_v37 = vadd.f32 %v1534_v61, %v1343_v32 }
 0x591   :  { %v1630_v38 = vand.u32 2147483647, %v3386_v36  ;;  %v1614_v20 = vmax.f32 %v3386_v36, 0.0 }
 0x592   :  { %v1629_v39 = vand.u32 2147483647, %v3388_v37  ;;  %v2229_v40 = vpop.f32.mrb[6].mxu0  ;;  %v1613_v9 = vmax.f32 %v3388_v37, 0.0 }
 0x593   :  { %v1646_v41 = vsub.f32 0.0, %v1630_v38  ;;  %v3392_v42 = vadd.f32 %v2229_v40, %v1358_v34  ;;  %v1544_v43 = vpop.f32.mrb[7].mxu0 }
 0x594   :  { %v1645_v10 = vsub.f32 0.0, %v1629_v39  ;;  %v3394_v13 = vadd.f32 %v1544_v43, %v1353_v58 }
 0x595   :  { %v1663_v44 = vmul.f32 1.442695, %v1646_v41  ;;  %v1632_v46 = vand.u32 2147483647, %v3392_v42  ;;  %v1616_v32 = vmax.f32 %v3392_v42, 0.0 }
 0x596   :  { %v1661_v21 = vmul.f32 1.442695, %v1645_v10  ;;  %v1631_v47 = vand.u32 2147483647, %v3394_v13  ;;  %v2232_v48 = vpop.f32.mrb[8].mxu0  ;;  %v1615_v40 = vmax.f32 %v3394_v13, 0.0 }
 0x597   :  { %2444 = vpow2.f32 %v1663_v44  ;;  %v1648_v49 = vsub.f32 0.0, %v1632_v46  ;;  %v3398_v25 = vadd.f32 %v2232_v48, %v1368_v7  ;;  %v1554_v52 = vpop.f32.mrb[9].mxu0 }
 0x598   :  { %2446 = vpow2.f32 %v1661_v21  ;;  %v1647_v45 = vsub.f32 0.0, %v1631_v47  ;;  %v3400_v29 = vadd.f32 %v1554_v52, %v1363_v17 }
 0x599   :  { %v1667_v53 = vmul.f32 1.442695, %v1648_v49  ;;  %v1634_v54 = vand.u32 2147483647, %v3398_v25  ;;  %v1618_v17 = vmax.f32 %v3398_v25, 0.0 }
 0x59a   :  { %v1665_v55 = vmul.f32 1.442695, %v1647_v45  ;;  %v1633_v56 = vand.u32 2147483647, %v3400_v29  ;;  %v2235_v59 = vpop.f32.mrb[10].mxu0 }
 0x59b   :  { %2448 = vpow2.f32 %v1667_v53  ;;  %v1650_v62 = vsub.f32 0.0, %v1634_v54  ;;  %v3404_v19 = vadd.f32 %v2235_v59, %v1378_v33  ;;  %v1564_v63 = vpop.f32.mrb[11].mxu0 }
 0x59c   :  { %2450 = vpow2.f32 %v1665_v55  ;;  %v1649_v0 = vsub.f32 0.0, %v1633_v56  ;;  %v3406_v1 = vadd.f32 %v1564_v63, %v1373_v60  ;;  %v1617_v56 = vmax.f32 %v3400_v29, 0.0 }
 0x59d   :  { %v1671_v2 = vmul.f32 1.442695, %v1650_v62  ;;  %v1636_v3 = vand.u32 2147483647, %v3404_v19 }
 0x59e   :  { %v1669_v4 = vmul.f32 1.442695, %v1649_v0  ;;  %v2238_v5 = vpop.f32.mrb[12].mxu0  ;;  %v1635_v12 = vand.u32 2147483647, %v3406_v1 }
 0x59f   :  { %2452 = vpow2.f32 %v1671_v2  ;;  %v1652_v6 = vsub.f32 0.0, %v1636_v3  ;;  %v1574_v8 = vpop.f32.mrb[13].mxu0  ;;  %v3410_v15 = vadd.f32 %v2238_v5, %v1388_v11  ;;  %v1398_v3 = vpop.permute.xlu1 %1397 }
 0x5a0   :  { %2454 = vpow2.f32 %v1669_v4  ;;  %v1651_v28 = vsub.f32 0.0, %v1635_v12  ;;  %v3418_v35 = vadd.f32 %v1574_v8, %v1383_v26 }
 0x5a1   :  { %v2445_v51 = vpop.eup %2444  ;;  %v1675_v14 = vmul.f32 1.442695, %v1652_v6  ;;  %v1638_v34 = vand.u32 2147483647, %v3410_v15 }
 0x5a2   :  { %v2447_v16 = vpop.eup %2446  ;;  %v1702_v18 = vadd.f32 1.0, %v2445_v51  ;;  %v1705_v22 = vmul.f32 -0.5, %v2445_v51  ;;  %v2241_v24 = vpop.f32.mrb[14].mxu0  ;;  %v1708_v61 = vand.u32 2147483647, %v2445_v51 }
 0x5a3   :  { %v1693_v23 = vadd.f32 1.0, %v2447_v16  ;;  %2456 = vpow2.f32 %v1675_v14  ;;  %v1696_v27 = vmul.f32 -0.5, %v2447_v16  ;;  %v3414_v31 = vpop.f32.mrb[15].mxu0  ;;  %v1699_v7 = vand.u32 2147483647, %v2447_v16 }
 0x5a4   :  { %2458 = vlog2.f32 %v1702_v18  ;;  %v1706_v43 = vadd.f32 1.0, %v1705_v22  ;;  %v1673_v47 = vmul.f32 1.442695, %v1651_v28  ;;  %v1654_v52 = vsub.f32 0.0, %v1638_v34 }
 0x5a5   :  { %v2449_v57 = vpop.eup %2448  ;;  %2460 = vlog2.f32 %v1693_v23  ;;  %v1697_v46 = vadd.f32 1.0, %v1696_v27  ;;  %v1637_v45 = vand.u32 2147483647, %v3418_v35  ;;  %vm3435_vm5 = vcmp.lt.f32.partialorder %v1708_v61, 0.0004427343 }
 0x5a6   :  { %v2451_v58 = vpop.eup %2450  ;;  %v1720_v38 = vadd.f32 1.0, %v2449_v57  ;;  %v1723_v39 = vmul.f32 -0.5, %v2449_v57  ;;  %v3421_v41 = vpop.f32.mrb[16].mxu0  ;;  %v1726_v49 = vand.u32 2147483647, %v2449_v57  ;;  %v1707_v60 = vmul.f32 %v2445_v51, %v1706_v43 }
 0x5a7   :  { %v1711_v10 = vadd.f32 1.0, %v2451_v58  ;;  %v3424_v44 = vpop.f32.mrb[17].mxu0  ;;  %v1714_v21 = vmul.f32 -0.5, %v2451_v58  ;;  %v1717_v33 = vand.u32 2147483647, %v2451_v58  ;;  %v1698_v4 = vmul.f32 %v2447_v16, %v1697_v46 }
 0x5a8   :  { %2462 = vlog2.f32 %v1720_v38  ;;  %v1724_v54 = vadd.f32 1.0, %v1723_v39  ;;  %vm3439_vm6 = vcmp.lt.f32.partialorder %v1699_v7, 0.0004427343  ;;  %v1653_v6 = vsub.f32 0.0, %v1637_v45 }
 0x5a9   :  { %v3426_v48 = vpop.eup %2452  ;;  %2464 = vlog2.f32 %v1711_v10  ;;  %v1715_v5 = vadd.f32 1.0, %v1714_v21  ;;  %vm3448_vm7 = vcmp.lt.f32.partialorder %v1726_v49, 0.0004427343  ;;  %v1679_v12 = vmul.f32 1.442695, %v1654_v52  ;;  %v1393_v10 = vpop.permute.xlu0 %1392 }
 0x5aa   :  { %v3429_v53 = vpop.eup %2454  ;;  %v1738_v55 = vadd.f32 1.0, %v3426_v48  ;;  %v3433_v59 = vpop.f32.mrb[18].mxu0  ;;  %v3452_v51 = vadd.f32 %v2241_v24, %v1398_v3  ;;  %v1725_v18 = vmul.f32 %v2449_v57, %v1724_v54  ;;  %vm3454_vm8 = vcmp.lt.f32.partialorder %v1717_v33, 0.0004427343 }
 0x5ab   :  { %v1729_v0 = vadd.f32 1.0, %v3429_v53  ;;  %v3444_v2 = vpop.f32.mrb[19].mxu0  ;;  %v1741_v16 = vmul.f32 -0.5, %v3426_v48  ;;  %v1744_v28 = vand.u32 2147483647, %v3426_v48  ;;  %v1716_v38 = vmul.f32 %v2451_v58, %v1715_v5  ;;  %v1408_v33 = vpop.permute.xlu1 %1407 }
 0x5ac   :  { %2466 = vlog2.f32 %v1738_v55  ;;  %v1677_v34 = vmul.f32 1.442695, %v1653_v6  ;;  %v1732_v24 = vmul.f32 -0.5, %v3429_v53  ;;  %v1735_v39 = vand.u32 2147483647, %v3429_v53 }
 0x5ad   :  { %v3446_v8 = vpop.eup %2456  ;;  %2468 = vlog2.f32 %v1729_v0  ;;  %v1640_v43 = vand.u32 2147483647, %v3452_v51  ;;  %v1742_v58 = vadd.f32 1.0, %v1741_v16  ;;  %v3473_v54 = vadd.f32 %v3414_v31, %v1393_v10 }
 0x5ae   :  { %v2459_v14 = vpop.eup %2458  ;;  %v1756_v23 = vadd.f32 1.0, %v3446_v8  ;;  %2470 = vpow2.f32 %v1673_v47  ;;  %vm3475_vm9 = vcmp.lt.f32.partialorder %v1744_v28, 0.0004427343  ;;  %vm3489_vm10 = vcmp.lt.f32.partialorder %v1735_v39, 0.0004427343 }
 0x5af   :  { %v2461_v26 = vpop.eup %2460  ;;  %v1704_v27 = vmul.f32 0.6931472, %v2459_v14  ;;  %v1656_v45 = vsub.f32 0.0, %v1640_v43  ;;  %v1403_v14 = vpop.permute.xlu0 %1402  ;;  %v1759_v22 = vmul.f32 -0.5, %v3446_v8 }
 0x5b0   :  { %v1695_v61 = vmul.f32 0.6931472, %v2461_v26  ;;  %2472 = vlog2.f32 %v1756_v23  ;;  %v1418_v5 = vpop.permute.xlu1 %1417 }
 0x5b1   :  { %v1710_v57 = vsel %vm3435_vm5, %v1707_v60, %v1704_v27  ;;  %2474 = vpow2.f32 %v1679_v12  ;;  %v1683_v63 = vmul.f32 1.442695, %v1656_v45 }
 0x5b2   :  { %v2463_v7 = vpop.eup %2462  ;;  %v1838_v46 = vadd.f32 %v1710_v57, %v1614_v20  ;;  %v1701_v21 = vsel %vm3439_vm6, %v1698_v4, %v1695_v61  ;;  %2476 = vpow2.f32 %v1677_v34  ;;  %v1733_v20 = vadd.f32 1.0, %v1732_v24 }
 0x5b3   :  { %v2465_v47 = vpop.eup %2464  ;;  %v1837_v49 = vadd.f32 %v1701_v21, %v1613_v9  ;;  %v1722_v52 = vmul.f32 0.6931472, %v2463_v7  ;;  %v3482_v9 = vadd.f32 %v3421_v41, %v1408_v33  ;;  %v1743_v4 = vmul.f32 %v3426_v48, %v1742_v58 }
 0x5b4   :  { %2478 = vtanh.f32 %v1838_v46  ;;  %v1713_v55 = vmul.f32 0.6931472, %v2465_v47  ;;  %v1639_v41 = vand.u32 2147483647, %v3473_v54 }
 0x5b5   :  { %2480 = vtanh.f32 %v1837_v49  ;;  %v1728_v62 = vsel %vm3448_vm7, %v1725_v18, %v1722_v52  ;;  %v1734_v18 = vmul.f32 %v3429_v53, %v1733_v20  ;;  %v1642_v23 = vand.u32 2147483647, %v3482_v9 }
 0x5b6   :  { %v2467_v0 = vpop.eup %2466  ;;  %v1840_v31 = vadd.f32 %v1728_v62, %v1616_v32  ;;  %v1719_v3 = vsel %vm3454_vm8, %v1716_v38, %v1713_v55  ;;  %2482 = vpow2.f32 %v1683_v63  ;;  %v1655_v38 = vsub.f32 0.0, %v1639_v41  ;;  %v1413_v41 = vpop.permute.xlu0 %1412 }
 0x5b7   :  { %v2469_v6 = vpop.eup %2468  ;;  %v1839_v11 = vadd.f32 %v1719_v3, %v1615_v40  ;;  %v1740_v12 = vmul.f32 0.6931472, %v2467_v0  ;;  %v3504_v40 = vadd.f32 %v3424_v44, %v1403_v14  ;;  %v1760_v44 = vadd.f32 1.0, %v1759_v22 }
 0x5b8   :  { %2484 = vtanh.f32 %v1840_v31  ;;  %v1731_v32 = vmul.f32 0.6931472, %v2469_v6  ;;  %v3498_v48 = vpop.eup %2470  ;;  %v1658_v39 = vsub.f32 0.0, %v1642_v23  ;;  %v1681_v58 = vmul.f32 1.442695, %v1655_v38 }
 0x5b9   :  { %2486 = vtanh.f32 %v1839_v11  ;;  %v1746_v16 = vsel %vm3475_vm9, %v1743_v4, %v1740_v12  ;;  %v1747_v28 = vadd.f32 1.0, %v3498_v48  ;;  %v1641_v43 = vand.u32 2147483647, %v3504_v40 }
 0x5ba   :  { %v2473_v26 = vpop.eup %2472  ;;  %v1842_v27 = vadd.f32 %v1746_v16, %v1618_v17  ;;  %v1737_v53 = vsel %vm3489_vm10, %v1734_v18, %v1731_v32  ;;  %v1762_v17 = vand.u32 2147483647, %v3446_v8  ;;  %v1620_v49 = vmax.f32 %v3404_v19, 0.0 }
 0x5bb   :  { %v3511_v34 = vpop.eup %2474  ;;  %v1841_v61 = vadd.f32 %v1737_v53, %v1617_v56  ;;  %v1758_v10 = vmul.f32 0.6931472, %v2473_v26  ;;  %v1761_v52 = vmul.f32 %v3446_v8, %v1760_v44  ;;  %v1750_v45 = vmul.f32 -0.5, %v3498_v48 }
 0x5bc   :  { %v3515_v24 = vpop.eup %2476  ;;  %2488 = vtanh.f32 %v1842_v27  ;;  %v1774_v57 = vadd.f32 1.0, %v3511_v34  ;;  %vm3528_vm11 = vcmp.lt.f32.partialorder %v1762_v17, 0.0004427343  ;;  %v1657_v60 = vsub.f32 0.0, %v1641_v43 }
 0x5bd   :  { %2490 = vtanh.f32 %v1841_v61  ;;  %v1765_v56 = vadd.f32 1.0, %v3515_v24  ;;  %v1777_v63 = vmul.f32 -0.5, %v3511_v34  ;;  %v1619_v3 = vmax.f32 %v3406_v1, 0.0 }
 0x5be   :  { %v2479_v7 = vpop.eup %2478  ;;  %2492 = vlog2.f32 %v1747_v28  ;;  %v1753_v4 = vand.u32 2147483647, %v3498_v48  ;;  %v1751_v11 = vadd.f32 1.0, %v1750_v45  ;;  %v1768_v12 = vmul.f32 -0.5, %v3515_v24 }
 0x5bf   :  { %v2481_v46 = vpop.eup %2480  ;;  %v1870_v21 = vmul.f32 %v2479_v7, %v3386_v36  ;;  %2494 = vlog2.f32 %v1774_v57  ;;  %v1687_v36 = vmul.f32 1.442695, %v1658_v39  ;;  %v1685_v32 = vmul.f32 1.442695, %v1657_v60 }
 0x5c0   :  { %v1869_v47 = vmul.f32 %v2481_v46, %v3388_v37  ;;  %v3526_v33 = vpop.eup %2482  ;;  %2496 = vlog2.f32 %v1765_v56  ;;  %v1764_v37 = vsel %vm3528_vm11, %v1761_v52, %v1758_v10  ;;  %v3542_v18 = vadd.f32 %v3433_v59, %v1418_v5 }
 0x5c1   :  { %v1792_v8 = vadd.f32 1.0, %v3526_v33  ;;  %2498 = vpow2.f32 %v1681_v58  ;;  %v1844_v14 = vadd.f32 %v1764_v37, %v1620_v49  ;;  %v1622_v16 = vmax.f32 %v3410_v15, 0.0 }
 0x5c2   :  { %v2485_v20 = vpop.eup %2484  ;;  %v2392_v62 = vpack.c.bf16 %v1870_v21, %v1869_v47  ;;  %v1778_v23 = vadd.f32 1.0, %v1777_v63  ;;  %v1780_v53 = vand.u32 2147483647, %v3511_v34  ;;  %v1644_v28 = vand.u32 2147483647, %v3542_v18 }
 0x5c3   :  { %v2487_v0 = vpop.eup %2486  ;;  %v1872_v31 = vmul.f32 %v2485_v20, %v3392_v42  ;;  %2500 = vlog2.f32 %v1792_v8  ;;  %v1752_v38 = vmul.f32 %v3498_v48, %v1751_v11  ;;  %vm3554_vm12 = vcmp.lt.f32.partialorder %v1753_v4, 0.0004427343 }
 0x5c4   :  { %v1871_v6 = vmul.f32 %v2487_v0, %v3394_v13  ;;  %2393 = vmatpush3.bf16.msra.mxu1 %v2392_v62  ;;  %2502 = vpow2.f32 %v1687_v36  ;;  %v3547_v13 = vadd.f32 %v3444_v2, %v1413_v41  ;;  %v1769_v57 = vadd.f32 1.0, %v1768_v12 }
 0x5c5   :  { %2394 = vmatprep.subr.bf16.mxu1 %v2642_v50  ;;  %2504 = vpow2.f32 %v1685_v32  ;;  %v1660_v39 = vsub.f32 0.0, %v1644_v28  ;;  %vm1781_vm13 = vcmp.lt.f32.partialorder %v1780_v53, 0.0004427343  ;;  %v1795_v21 = vmul.f32 -0.5, %v3526_v33 }
 0x5c6   :  { %v2489_v42 = vpop.eup %2488  ;;  %v2395_v22 = vpack.c.bf16 %v1872_v31, %v1871_v6  ;;  %2506 = vtanh.f32 %v1844_v14  ;;  %v1643_v48 = vand.u32 2147483647, %v3547_v13  ;;  %v1770_v52 = vmul.f32 %v3515_v24, %v1769_v57 }
 0x5c7   :  { %v2491_v26 = vpop.eup %2490  ;;  %v1874_v27 = vmul.f32 %v2489_v42, %v3398_v25  ;;  %v1771_v25 = vand.u32 2147483647, %v3515_v24  ;;  %v1691_v56 = vmul.f32 1.442695, %v1660_v39  ;;  %v1796_v8 = vadd.f32 1.0, %v1795_v21 }
 0x5c8   :  { %v2493_v59 = vpop.eup %2492  ;;  %v1873_v61 = vmul.f32 %v2491_v26, %v3400_v29  ;;  %2396 = vmatpush3.bf16.msra.mxu1 %v2395_v22  ;;  %v1779_v29 = vmul.f32 %v3511_v34, %v1778_v23  ;;  %v1621_v34 = vmax.f32 %v3418_v35, 0.0  ;;  %v1659_v62 = vsub.f32 0.0, %v1643_v48 }
 0x5c9   :  { %v2495_v2 = vpop.eup %2494  ;;  %v1749_v17 = vmul.f32 0.6931472, %v2493_v59  ;;  %2397 = vmatprep.subr.bf16.mxu1 %v2642_v50  ;;  %vm1772_vm14 = vcmp.lt.f32.partialorder %v1771_v25, 0.0004427343  ;;  %2508 = vpow2.f32 %v1691_v56  ;;  %v1798_v24 = vand.u32 2147483647, %v3526_v33 }
 0x5ca   :  { %v2398_v43 = vpack.c.bf16 %v1874_v27, %v1873_v61  ;;  %v1776_v7 = vmul.f32 0.6931472, %v2495_v2  ;;  %v2497_v10 = vpop.eup %2496  ;;  %v1689_v4 = vmul.f32 1.442695, %v1659_v62  ;;  %v1797_v6 = vmul.f32 %v3526_v33, %v1796_v8 }
 0x5cb   :  { %v1755_v46 = vsel %vm3554_vm12, %v1752_v38, %v1749_v17  ;;  %v1767_v49 = vmul.f32 0.6931472, %v2497_v10  ;;  %v2499_v45 = vpop.eup %2498  ;;  %vm1799_vm15 = vcmp.lt.f32.partialorder %v1798_v24, 0.0004427343  ;;  %v1624_v32 = vmax.f32 %v3452_v51, 0.0 }
 0x5cc   :  { %v1843_v58 = vadd.f32 %v1755_v46, %v1619_v3  ;;  %v1782_v47 = vsel %vm1781_vm13, %v1779_v29, %v1776_v7  ;;  %2399 = vmatpush3.bf16.msra.mxu1 %v2398_v43  ;;  %v1783_v20 = vadd.f32 1.0, %v2499_v45  ;;  %v1786_v11 = vmul.f32 -0.5, %v2499_v45 }
 0x5cd   :  { %v1846_v55 = vadd.f32 %v1782_v47, %v1622_v16  ;;  %2400 = vmatprep.subr.bf16.mxu1 %v2642_v50  ;;  %v2501_v36 = vpop.eup %2500  ;;  %v1773_v60 = vsel %vm1772_vm14, %v1770_v52, %v1767_v49  ;;  %v1789_v27 = vand.u32 2147483647, %v2499_v45  ;;  %v1623_v57 = vmax.f32 %v3473_v54, 0.0 }
 0x5ce   :  { %2510 = vtanh.f32 %v1843_v58  ;;  %v2503_v37 = vpop.eup %2502  ;;  %v1845_v63 = vadd.f32 %v1773_v60, %v1621_v34  ;;  %v1794_v3 = vmul.f32 0.6931472, %v2501_v36  ;;  %v1787_v16 = vadd.f32 1.0, %v1786_v11 }
 0x5cf   :  { %2512 = vtanh.f32 %v1846_v55  ;;  %v1810_v0 = vadd.f32 1.0, %v2503_v37  ;;  %v2505_v31 = vpop.eup %2504  ;;  %v1813_v14 = vmul.f32 -0.5, %v2503_v37  ;;  %v1816_v2 = vand.u32 2147483647, %v2503_v37 }
 0x5d0   :  { %2514 = vlog2.f32 %v1783_v20  ;;  %v2507_v5 = vpop.eup %2506  ;;  %v1801_v12 = vadd.f32 1.0, %v2505_v31  ;;  %v1800_v41 = vsel %vm1799_vm15, %v1797_v6, %v1794_v3  ;;  %v1804_v53 = vmul.f32 -0.5, %v2505_v31 }
 0x5d1   :  { %2516 = vtanh.f32 %v1845_v63  ;;  %v1876_v22 = vmul.f32 %v2507_v5, %v3404_v19  ;;  %v1848_v26 = vadd.f32 %v1800_v41, %v1624_v32  ;;  %v1814_v61 = vadd.f32 1.0, %v1813_v14 }
 0x5d2   :  { %2518 = vlog2.f32 %v1810_v0  ;;  %v1788_v39 = vmul.f32 %v2499_v45, %v1787_v16  ;;  %v1626_v43 = vmax.f32 %v3482_v9, 0.0  ;;  %vm1790_vm0 = vcmp.lt.f32.partialorder %v1789_v27, 0.0004427343 }
 0x5d3   :  { %2520 = vlog2.f32 %v1801_v12  ;;  %v2509_v42 = vpop.eup %2508  ;;  %v1815_v46 = vmul.f32 %v2503_v37, %v1814_v61  ;;  %vm1817_vm1 = vcmp.lt.f32.partialorder %v1816_v2, 0.0004427343  ;;  %v1625_v34 = vmax.f32 %v3504_v40, 0.0 }
 0x5d4   :  { %2522 = vpow2.f32 %v1689_v4  ;;  %v1828_v28 = vadd.f32 1.0, %v2509_v42  ;;  %v1831_v58 = vmul.f32 -0.5, %v2509_v42  ;;  %v1834_v37 = vand.u32 2147483647, %v2509_v42 }
 0x5d5   :  { %v1628_v5 = vmax.f32 %v3542_v18, 0.0 }
 0x5d6   :  { %2524 = vlog2.f32 %v1828_v28  ;;  %v1832_v20 = vadd.f32 1.0, %v1831_v58  ;;  %vm1835_vm3 = vcmp.lt.f32.partialorder %v1834_v37, 0.0004427343 }
 0x5d7   :  { %2526 = vtanh.f32 %v1848_v26 }
 0x5d8   :  { %v2511_v23 = vpop.eup %2510  ;;  %v1833_v0 = vmul.f32 %v2509_v42, %v1832_v20 }
 0x5d9   :  { %v2513_v59 = vpop.eup %2512  ;;  %v1875_v33 = vmul.f32 %v2511_v23, %v3406_v1  ;;  %v1805_v1 = vadd.f32 1.0, %v1804_v53  ;;  %v1627_v53 = vmax.f32 %v3547_v13, 0.0 }
 0x5da   :  { %v2515_v38 = vpop.eup %2514  ;;  %v1878_v44 = vmul.f32 %v2513_v59, %v3410_v15  ;;  %v1807_v15 = vand.u32 2147483647, %v2505_v31 }
 0x5db   :  { %v2517_v17 = vpop.eup %2516  ;;  %v2401_v25 = vpack.c.bf16 %v1876_v22, %v1875_v33  ;;  %v1785_v19 = vmul.f32 0.6931472, %v2515_v38  ;;  %v1806_v55 = vmul.f32 %v2505_v31, %v1805_v1 }
 0x5dc   :  { %v2519_v7 = vpop.eup %2518  ;;  %v1877_v29 = vmul.f32 %v2517_v17, %v3418_v35  ;;  %vm1808_vm2 = vcmp.lt.f32.partialorder %v1807_v15, 0.0004427343 }
 0x5dd   :  { %v1791_v48 = vsel %vm1790_vm0, %v1788_v39, %v1785_v19  ;;  %v1812_v10 = vmul.f32 0.6931472, %v2519_v7  ;;  %2402 = vmatpush3.bf16.msra.mxu1 %v2401_v25  ;;  %v2521_v47 = vpop.eup %2520 }
 0x5de   :  { %v2404_v21 = vpack.c.bf16 %v1878_v44, %v1877_v29  ;;  %v1847_v56 = vadd.f32 %v1791_v48, %v1623_v57  ;;  %2403 = vmatprep.subr.bf16.mxu1 %v2642_v50  ;;  %v2523_v52 = vpop.eup %2522  ;;  %v1803_v35 = vmul.f32 0.6931472, %v2521_v47  ;;  %v1885_v57 = vld [vmem:[#allocation8] sm:$0x1] }
 0x5df   :  { %v1818_v49 = vsel %vm1817_vm1, %v1815_v46, %v1812_v10  ;;  %v1819_v36 = vadd.f32 1.0, %v2523_v52  ;;  %v1822_v3 = vmul.f32 -0.5, %v2523_v52  ;;  %v1825_v14 = vand.u32 2147483647, %v2523_v52 }
 0x5e0   :  { %2528 = vtanh.f32 %v1847_v56  ;;  %v1850_v45 = vadd.f32 %v1818_v49, %v1626_v43  ;;  %v1809_v60 = vsel %vm1808_vm2, %v1806_v55, %v1803_v35  ;;  %v2525_v63 = vpop.eup %2524 }
 0x5e1   :  { %2405 = vmatpush3.bf16.msra.mxu1 %v2404_v21  ;;  %v1849_v62 = vadd.f32 %v1809_v60, %v1625_v34  ;;  %v1830_v8 = vmul.f32 0.6931472, %v2525_v63  ;;  %v2527_v24 = vpop.eup %2526  ;;  %v1823_v11 = vadd.f32 1.0, %v1822_v3  ;;  %vm1826_vm4 = vcmp.lt.f32.partialorder %v1825_v14, 0.0004427343 }
 0x5e2   :  { %2530 = vtanh.f32 %v1850_v45  ;;  %2406 = vmatprep.subr.bf16.mxu1 %v2642_v50  ;;  %v1880_v4 = vmul.f32 %v2527_v24, %v3452_v51 }
 0x5e3   :  { %2532 = vlog2.f32 %v1819_v36  ;;  %v1836_v31 = vsel %vm1835_vm3, %v1833_v0, %v1830_v8  ;;  %v1824_v42 = vmul.f32 %v2523_v52, %v1823_v11 }
 0x5e4   :  { %2534 = vtanh.f32 %v1849_v62  ;;  %v1852_v41 = vadd.f32 %v1836_v31, %v1628_v5 }
 0x5e6   :  { %2536 = vtanh.f32 %v1852_v41 }
 0x5ea   :  { %v2529_v6 = vpop.eup %2528 }
 0x5eb   :  { %v1879_v12 = vmul.f32 %v2529_v6, %v3473_v54 }
 0x5ec   :  { %v2531_v32 = vpop.eup %2530 }
 0x5ed   :  { %v2533_v22 = vpop.eup %2532  ;;  %v2407_v16 = vpack.c.bf16 %v1880_v4, %v1879_v12  ;;  %v1882_v23 = vmul.f32 %v2531_v32, %v3482_v9 }
 0x5ee   :  { %v1821_v26 = vmul.f32 0.6931472, %v2533_v22  ;;  %v2535_v27 = vpop.eup %2534 }
 0x5ef   :  { %2408 = vmatpush3.bf16.msra.mxu1 %v2407_v16  ;;  %v1881_v51 = vmul.f32 %v2535_v27, %v3504_v40  ;;  %v1890_v40 = vpop.permute.xlu0 %1889 }
 0x5f0   :  { %v1827_v28 = vsel %vm1826_vm4, %v1824_v42, %v1821_v26  ;;  %2409 = vmatprep.subr.bf16.mxu1 %v2642_v50  ;;  %v2537_v9 = vpop.eup %2536  ;;  %v1895_v2 = vrot.slane %v1890_v40, %v2972_v30 }
 0x5f1   :  { %v1851_v54 = vadd.f32 %v1827_v28, %v1627_v53  ;;  %v2410_v59 = vpack.c.bf16 %v1882_v23, %v1881_v51  ;;  %v1884_v33 = vmul.f32 %v2537_v9, %v3542_v18 }
 0x5f3   :  { %2538 = vtanh.f32 %v1851_v54  ;;  %2411 = vmatpush3.bf16.msra.mxu1 %v2410_v59 }
 0x5f4   :  { %2412 = vmatprep.subr.bf16.mxu1 %v2642_v50 }
 0x5fd   :  { %v2539_v61 = vpop.eup %2538 }
 0x5fe   :  { %v1883_v38 = vmul.f32 %v2539_v61, %v3547_v13 }
 0x600   :  { %v2413_v44 = vpack.c.bf16 %v1884_v33, %v1883_v38 }
 0x602   :  { %2414 = vmatpush3.bf16.msra.mxu1 %v2413_v44 }
 0x605   :  { %2281 = vmatmul.mubr.f32.vlgmr.msra.gmra.mrb[4].mxu1 %v1885_v57 }
 0x6d8   :  { %v1962_v17 = vpop.f32.mrb[4].mxu1 }
 0x6d9   :  { %v1963_v25 = vadd.f32 %v1962_v17, %v1895_v2  ;;  %v2282_v19 = vpop.f32.mrb[5].mxu1 }
 0x6db   :  { %1966 = vst [vmem:[%s3609_s15] sm:$0x1] %v1963_v25 }
 0x6dc   :  { %1971 = vsyncpa [#allocation4], 1 }
 0x6dd   :  { %1972 = vsyncpa [#allocation6], 1 }
 0x6de   :  { %1973 = vsyncpa [#allocation9], 1 }

</bundles_post_ra>
